<compile_context>
chip_gen: v7x
topology: tpu7x:2x2x1
jax: 0.10.0
libtpu: 0.0.40
codegen_flags: <defaults>
</compile_context>

<pallas_src>
import functools
import math

import jax
import jax.numpy as jnp
from jax import lax
from jax.experimental import pallas as pl
from jax.experimental.pallas import tpu as pltpu


def _gelu_exact(x):
    # Matches torch.nn.GELU() default (erf-based, non-approximate).
    return 0.5 * x * (1.0 + lax.erf(x * (1.0 / math.sqrt(2.0))))


def _gelu_tanh(x):
    # tanh-approximate GELU (EUP path); ~1e-3 off torch-exact, gated by flag.
    c = math.sqrt(2.0 / math.pi)
    return 0.5 * x * (1.0 + jnp.tanh(c * (x + 0.044715 * x * x * x)))


def _hint8(off):
    # Alignment hint for dynamic pl.ds starts (static ints need no hint).
    return off if isinstance(off, int) else pl.multiple_of(off, 8)


def dwcff_kernel(x_ref, w1_ref, b1_ref, dww_ref, dwb_ref, w2_ref, b2_ref,
                 out_ref, pad_ref, *, H, W, Wp, SH, approx_gelu):
    """One batch element per grid step (grid axis 0 == batch, 'parallel').

    x_ref:   (Lp, C)      compute dtype (W already padded to Wp, Lp = H*Wp)
    pad_ref: (Lp+2Wp, hid) compute dtype scratch: zero halo row block, image,
                           zero halo row block (rows -1 and H of the image).
    out_ref: (Lp, OP)      lane-dense (OP multiple of 128) output.
    """
    Lp = H * Wp
    hidden = w1_ref.shape[1]
    SL = SH * Wp                      # flat rows per strip (multiple of 8/16)
    nstrips = H // SH
    cdt = w1_ref.dtype                # matmul / scratch compute dtype
    gelu = _gelu_tanh if approx_gelu else _gelu_exact

    # ---- zero only the 2*Wp halo rows (cheap, per-step so 'parallel' is safe)
    zrow = jnp.zeros((Wp, hidden), cdt)
    pad_ref[pl.ds(0, Wp), :] = zrow
    pad_ref[pl.ds(Wp + Lp, Wp), :] = zrow

    # ---- loop-invariant values (hoisted: JAX does not CSE broadcasts) -------
    b1 = b1_ref[...]                                   # (1, hidden) f32
    dwb = dwb_ref[...]                                 # (1, hidden) f32
    b2 = b2_ref[...]                                   # (1, OP)     f32
    dww = dww_ref[...]                                 # (9, hidden) f32
    wrow = [dww[k:k + 1, :] for k in range(9)]         # per-tap weight rows

    widx = lax.broadcasted_iota(jnp.int32, (SL, 1), 0) % Wp
    first_col = widx == 0
    last_col = widx == (W - 1)
    col_valid = widx < W               # only used when Wp != W

    def linear1_strip(t):
        """linear1 + GELU for image-row strip t -> bf16 rows of pad_ref."""
        off = _hint8(t * SL)
        xs = x_ref[pl.ds(off, SL), :]                               # (SL, C)
        h1 = jnp.dot(xs, w1_ref[...], preferred_element_type=jnp.float32)
        a = gelu(h1 + b1)
        if Wp != W:
            # zero pad columns so they behave exactly like the conv zero pad
            a = jnp.where(col_valid, a, 0.0)
        pad_ref[pl.ds(off + Wp, SL), :] = a.astype(cdt)

    def conv_linear2_strip(s):
        """depthwise 3x3 (pad=1) + GELU + linear2 for strip s -> out_ref."""
        off = _hint8(s * SL)
        # H-direction taps: sublane-aligned slices of the H-padded image.
        t0 = pad_ref[pl.ds(off, SL), :].astype(jnp.float32)           # h-1
        t1 = pad_ref[pl.ds(off + Wp, SL), :].astype(jnp.float32)      # h
        t2 = pad_ref[pl.ds(off + 2 * Wp, SL), :].astype(jnp.float32)  # h+1
        # Three independent partial accumulators (one per kernel column dw).
        col0 = t0 * wrow[0] + t1 * wrow[3] + t2 * wrow[6]             # dw=0
        col1 = t0 * wrow[1] + t1 * wrow[4] + t2 * wrow[7]             # dw=1
        col2 = t0 * wrow[2] + t1 * wrow[5] + t2 * wrow[8]             # dw=2
        # W-direction shifts on the XLU (roll) + column-boundary masks; the
        # flat-roll wraparound only lands on masked (or zero-pad) positions.
        left = jnp.where(first_col, 0.0, pltpu.roll(col0, 1, axis=0))
        right = jnp.where(last_col, 0.0, pltpu.roll(col2, SL - 1, axis=0))
        conv = left + col1 + right + dwb
        h2 = gelu(conv).astype(cdt)                                   # (SL,hid)
        o = jnp.dot(h2, w2_ref[...], preferred_element_type=jnp.float32)
        out_ref[pl.ds(off, SL), :] = (o + b2).astype(out_ref.dtype)

    # ---- software-pipelined fusion: linear1 runs one strip ahead of the conv
    # (conv strip s needs the first Wp rows of linear1 strip s+1 as its halo).
    linear1_strip(0)
    if nstrips > 1:
        def body(s, carry):
            linear1_strip(s + 1)
            conv_linear2_strip(s)
            return carry
        lax.fori_loop(0, nstrips - 1, body, 0, unroll=2)   # capped unroll
    conv_linear2_strip(nstrips - 1)


def _pick_vmem_limit_bytes():
    """Generation-aware VMEM cap.

    v7x has only 64 MiB physical VMEM per TC -> leave headroom (~52 MiB);
    v5e/v6e have 128 MiB -> allow up to ~100 MiB. Safe 48 MiB fallback if the
    hardware query is unavailable.
    """
    try:
        cap = int(pltpu.get_tpu_info().vmem_capacity_bytes)
        return max(min(cap - 12 * 1024 * 1024, 100 * 1024 * 1024),
                   32 * 1024 * 1024)
    except Exception:
        return 48 * 1024 * 1024


def dwcff_forward(x, params, input_size, *, compute_dtype=jnp.bfloat16,
                  approx_gelu=False, strip_rows=None, out_dtype=None):
    B, L, C = x.shape
    H, W = input_size
    assert H * W == L, "output H x W is not the same with L!"
    w1, b1, dw_w, dw_b, w2, b2 = params
    hidden = w1.shape[1]
    out_dim = w2.shape[1]
    out_dtype = x.dtype if out_dtype is None else out_dtype

    # ---- pad W up to the sublane tile so all H-tap / strip offsets stay
    # sublane-aligned (8 rows for 4-byte scratch, 16 for 2-byte scratch).
    sub = 8 if jnp.dtype(compute_dtype).itemsize >= 4 else 16
    Wp = ((W + sub - 1) // sub) * sub
    Lp = H * Wp
    if Wp != W:
        x_in = jnp.pad(x.reshape(B, H, W, C),
                       ((0, 0), (0, 0), (0, Wp - W), (0, 0))).reshape(B, Lp, C)
    else:
        x_in = x
    x_in = x_in.astype(compute_dtype)          # halves x HBM->VMEM DMA (bf16)
    w1c = w1.astype(compute_dtype)

    # ---- lane-dense output: pad out_dim to a multiple of 128 (zero MXU
    # columns are free); sliced back below. The extra OP-out_dim HBM writeback
    # columns are an accepted trade for unmasked lane-dense stores.
    OP = ((out_dim + 127) // 128) * 128
    if OP != out_dim:
        w2p = jnp.zeros((hidden, OP), w2.dtype).at[:, :out_dim].set(w2)
        b2p = jnp.zeros((1, OP), b2.dtype).at[:, :out_dim].set(b2)
    else:
        w2p, b2p = w2, b2
    w2c = w2p.astype(compute_dtype)

    # ---- rows per conv strip: smallest divisor of H whose strip fills the MXU
    # M-dimension (SL = SH*Wp >= 256); SL is always a multiple of the sublane
    # tile because Wp is, so the old misaligned fallback is gone.
    if strip_rows is None:
        strip_rows = next(
            (d for d in range(1, H + 1) if H % d == 0 and d * Wp >= 256), H)
    SH = strip_rows
    assert H % SH == 0

    kernel = functools.partial(dwcff_kernel, H=H, W=W, Wp=Wp, SH=SH,
                               approx_gelu=approx_gelu)
    out = pl.pallas_call(
        kernel,
        out_shape=jax.ShapeDtypeStruct((B, Lp, OP), out_dtype),
        grid_spec=pltpu.PrefetchScalarGridSpec(
            num_scalar_prefetch=0,
            grid=(B,),
            in_specs=[
                pl.BlockSpec((None, Lp, C), lambda b: (b, 0, 0)),     # x (cdt)
                pl.BlockSpec((C, hidden), lambda b: (0, 0)),          # w1 (cdt)
                pl.BlockSpec((1, hidden), lambda b: (0, 0)),          # b1
                pl.BlockSpec((9, hidden), lambda b: (0, 0)),          # dw weights
                pl.BlockSpec((1, hidden), lambda b: (0, 0)),          # dw bias
                pl.BlockSpec((hidden, OP), lambda b: (0, 0)),         # w2 (cdt)
                pl.BlockSpec((1, OP), lambda b: (0, 0)),              # b2 (padded)
            ],
            out_specs=pl.BlockSpec((None, Lp, OP), lambda b: (b, 0, 0)),
            scratch_shapes=[
                # H-padded image of gelu(linear1), stored in compute dtype.
                pltpu.VMEM((Lp + 2 * Wp, hidden), compute_dtype),
            ],
        ),
        compiler_params=pltpu.CompilerParams(
            dimension_semantics=("parallel",),
            vmem_limit_bytes=_pick_vmem_limit_bytes()),
    )(x_in, w1c, b1, dw_w, dw_b, w2c, b2p)

    if Wp != W:
        out = out.reshape(B, H, Wp, OP)[:, :, :W, :out_dim].reshape(B, L, out_dim)
    elif OP != out_dim:
        out = out[:, :, :out_dim]
    return out


def dwcff_reference(x, params, input_size, *, compute_dtype=jnp.bfloat16,
                    approx_gelu=False):
    """Pure-JAX reference matching the PyTorch forward (mirrors kernel dtypes)."""
    B, L, C = x.shape
    H, W = input_size
    w1, b1, dw_w, dw_b, w2, b2 = params
    hidden = w1.shape[1]
    gelu = _gelu_tanh if approx_gelu else _gelu_exact
    h1 = gelu(jnp.dot(x.astype(compute_dtype), w1.astype(compute_dtype),
                      preferred_element_type=jnp.float32) + b1)       # (B,L,hid)
    # Mirror the kernel's compute-dtype storage of the conv input.
    h1 = h1.astype(compute_dtype).astype(jnp.float32)
    img = h1.reshape(B, H, W, hidden)                                 # NHWC
    k = dw_w.reshape(3, 3, 1, hidden)                                 # HWIO depthwise
    conv = lax.conv_general_dilated(
        img, k, window_strides=(1, 1), padding="SAME",
        dimension_numbers=("NHWC", "HWIO", "NHWC"),
        feature_group_count=hidden,
        precision=lax.Precision.HIGHEST)
    conv = gelu(conv + dw_b.reshape(1, 1, 1, hidden))
    h2 = conv.reshape(B, L, hidden).astype(compute_dtype)
    out = jnp.dot(h2, w2.astype(compute_dtype),
                  preferred_element_type=jnp.float32) + b2
    return out


def init_params(key, dim, hidden_dim, out_dim):
    """Deterministic synthetic parameters in kernel-friendly layouts.

    w1: (dim, hidden)       == torch linear1.weight.T
    b1: (1, hidden)
    dw_w: (9, hidden)       dw_w[dh*3+dw, c] == torch conv.weight[c, 0, dh, dw]
    dw_b: (1, hidden)
    w2: (hidden, out_dim)   == torch linear2.weight.T
    b2: (1, out_dim)
    """
    ks = jax.random.split(key, 6)
    s1 = 1.0 / math.sqrt(dim)
    s_dw = 1.0 / math.sqrt(9.0)
    s2 = 1.0 / math.sqrt(hidden_dim)
    w1 = jax.random.uniform(ks[0], (dim, hidden_dim), jnp.float32, -s1, s1)
    b1 = jax.random.uniform(ks[1], (1, hidden_dim), jnp.float32, -s1, s1)
    dw_w = jax.random.uniform(ks[2], (9, hidden_dim), jnp.float32, -s_dw, s_dw)
    dw_b = jax.random.uniform(ks[3], (1, hidden_dim), jnp.float32, -s_dw, s_dw)
    w2 = jax.random.uniform(ks[4], (hidden_dim, out_dim), jnp.float32, -s2, s2)
    b2 = jax.random.uniform(ks[5], (1, out_dim), jnp.float32, -s2, s2)
    return (w1, b1, dw_w, dw_b, w2, b2)


if __name__ == "__main__":
    B = 2
    dim, hidden_dim, out_dim = 32, 128, 32

    key = jax.random.PRNGKey(0)
    kx, kp = jax.random.split(key)
    params = init_params(kp, dim, hidden_dim, out_dim)

    # (H, W, strip_rows, approx_gelu):
    #   16x16 default strips (single 256-row strip), 16x16 multi-strip
    #   pipelined path, and 12x12 (W % 8 != 0 -> padded-width path) with the
    #   tanh-GELU (EUP) variant.
    cases = [
        (16, 16, None, False),
        (16, 16, 2, False),
        (12, 12, 3, True),
    ]
    for (H, W, sr, approx) in cases:
        L = H * W
        x = jax.random.normal(jax.random.fold_in(kx, H * 1000 + W),
                              (B, L, dim), jnp.float32)
        out = jax.block_until_ready(
            dwcff_forward(x, params, (H, W), strip_rows=sr, approx_gelu=approx))
        ref = dwcff_reference(x, params, (H, W), approx_gelu=approx)
        assert out.shape == (B, L, out_dim)
        max_err = float(jnp.max(jnp.abs(out - ref)))
        assert jnp.allclose(out, ref, atol=3e-3, rtol=3e-3), (
            f"mismatch vs reference at H={H} W={W} strips={sr} "
            f"(max abs err {max_err})")

    print("KERNEL_OK")
</pallas_src>

<mosaic_0001>
module attributes {stable_mosaic.version = 11 : i64} {
  func.func @dwcff_kernel(%arg0: i32, %arg1: memref<1x256x32xbf16, #tpu.memory_space<vmem>>, %arg2: memref<32x128xbf16, #tpu.memory_space<vmem>>, %arg3: memref<1x128xf32, #tpu.memory_space<vmem>>, %arg4: memref<9x128xf32, #tpu.memory_space<vmem>>, %arg5: memref<1x128xf32, #tpu.memory_space<vmem>>, %arg6: memref<128x128xbf16, #tpu.memory_space<vmem>>, %arg7: memref<1x128xf32, #tpu.memory_space<vmem>>, %arg8: memref<1x256x128xf32, #tpu.memory_space<vmem>>, %arg9: memref<288x128xbf16, #tpu.memory_space<vmem>>) attributes {dimension_semantics = [#tpu.dimension_semantics<parallel>], iteration_bounds = array<i64: 2>, scalar_prefetch = 0 : i64, scratch_operands = 1 : i64, tpu.core_type = #tpu.core_type<tc>, window_params = [{transform_indices = @transform_0, window_bounds = array<i64: 1, 256, 32>}, {pipeline_mode = #tpu.pipeline_mode<synchronous>, transform_indices = @transform_1, window_bounds = array<i64: 32, 128>}, {pipeline_mode = #tpu.pipeline_mode<synchronous>, transform_indices = @transform_2, window_bounds = array<i64: 1, 128>}, {pipeline_mode = #tpu.pipeline_mode<synchronous>, transform_indices = @transform_3, window_bounds = array<i64: 9, 128>}, {pipeline_mode = #tpu.pipeline_mode<synchronous>, transform_indices = @transform_4, window_bounds = array<i64: 1, 128>}, {pipeline_mode = #tpu.pipeline_mode<synchronous>, transform_indices = @transform_5, window_bounds = array<i64: 128, 128>}, {pipeline_mode = #tpu.pipeline_mode<synchronous>, transform_indices = @transform_6, window_bounds = array<i64: 1, 128>}, {transform_indices = @transform_7, window_bounds = array<i64: 1, 256, 128>}]} {
    %cst = arith.constant 0.000000e+00 : bf16
    %0 = vector.broadcast %cst : bf16 to vector<16x128xbf16>
    %c0 = arith.constant 0 : index
    %c0_0 = arith.constant 0 : index
    %1 = vector.load %arg9[%c0, %c0_0] : memref<288x128xbf16, #tpu.memory_space<vmem>>, vector<16x128xbf16>
    tpu.vector_store %arg9[%c0, %c0_0], %0 {strides = array<i32>} : memref<288x128xbf16, #tpu.memory_space<vmem>>, vector<16x128xbf16>,
    %c272 = arith.constant 272 : index
    %c0_1 = arith.constant 0 : index
    %2 = vector.load %arg9[%c272, %c0_1] : memref<288x128xbf16, #tpu.memory_space<vmem>>, vector<16x128xbf16>
    tpu.vector_store %arg9[%c272, %c0_1], %0 {strides = array<i32>} : memref<288x128xbf16, #tpu.memory_space<vmem>>, vector<16x128xbf16>,
    %c0_2 = arith.constant 0 : index
    %c0_3 = arith.constant 0 : index
    %3 = vector.load %arg3[%c0_2, %c0_3] : memref<1x128xf32, #tpu.memory_space<vmem>>, vector<1x128xf32>
    %c0_4 = arith.constant 0 : index
    %c0_5 = arith.constant 0 : index
    %4 = vector.load %arg5[%c0_4, %c0_5] : memref<1x128xf32, #tpu.memory_space<vmem>>, vector<1x128xf32>
    %c0_6 = arith.constant 0 : index
    %c0_7 = arith.constant 0 : index
    %5 = vector.load %arg7[%c0_6, %c0_7] : memref<1x128xf32, #tpu.memory_space<vmem>>, vector<1x128xf32>
    %c0_8 = arith.constant 0 : index
    %c0_9 = arith.constant 0 : index
    %6 = vector.load %arg4[%c0_8, %c0_9] : memref<9x128xf32, #tpu.memory_space<vmem>>, vector<9x128xf32>
    %7 = vector.extract_strided_slice %6 {offsets = [0, 0], sizes = [1, 128], strides = [1, 1]} : vector<9x128xf32> to vector<1x128xf32>
    %8 = vector.extract_strided_slice %6 {offsets = [1, 0], sizes = [1, 128], strides = [1, 1]} : vector<9x128xf32> to vector<1x128xf32>
    %9 = vector.extract_strided_slice %6 {offsets = [2, 0], sizes = [1, 128], strides = [1, 1]} : vector<9x128xf32> to vector<1x128xf32>
    %10 = vector.extract_strided_slice %6 {offsets = [3, 0], sizes = [1, 128], strides = [1, 1]} : vector<9x128xf32> to vector<1x128xf32>
    %11 = vector.extract_strided_slice %6 {offsets = [4, 0], sizes = [1, 128], strides = [1, 1]} : vector<9x128xf32> to vector<1x128xf32>
    %12 = vector.extract_strided_slice %6 {offsets = [5, 0], sizes = [1, 128], strides = [1, 1]} : vector<9x128xf32> to vector<1x128xf32>
    %13 = vector.extract_strided_slice %6 {offsets = [6, 0], sizes = [1, 128], strides = [1, 1]} : vector<9x128xf32> to vector<1x128xf32>
    %14 = vector.extract_strided_slice %6 {offsets = [7, 0], sizes = [1, 128], strides = [1, 1]} : vector<9x128xf32> to vector<1x128xf32>
    %15 = vector.extract_strided_slice %6 {offsets = [8, 0], sizes = [1, 128], strides = [1, 1]} : vector<9x128xf32> to vector<1x128xf32>
    %16 = tpu.iota {dimensions = array<i32: 0>} : vector<256x1xi32>
    %c16_i32 = arith.constant 16 : i32
    %c0_i32 = arith.constant 0 : i32
    %17 = arith.cmpi eq, %c16_i32, %c0_i32 : i32
    %c1_i32 = arith.constant 1 : i32
    %18 = arith.select %17, %c1_i32, %c16_i32 : i32
    %19 = vector.broadcast %18 : i32 to vector<256x1xi32>
    %20 = arith.remsi %16, %19 : vector<256x1xi32>
    %c0_i32_10 = arith.constant 0 : i32
    %21 = vector.broadcast %c0_i32_10 : i32 to vector<256x1xi32>
    %22 = arith.cmpi ne, %20, %21 : vector<256x1xi32>
    %c0_i32_11 = arith.constant 0 : i32
    %23 = vector.broadcast %c0_i32_11 : i32 to vector<256x1xi32>
    %24 = arith.cmpi slt, %20, %23 : vector<256x1xi32>
    %c0_i32_12 = arith.constant 0 : i32
    %25 = arith.cmpi slt, %18, %c0_i32_12 : i32
    %26 = vector.broadcast %25 : i1 to vector<256x1xi1>
    %27 = vector.broadcast %26 : vector<256x1xi1> to vector<256x1xi1>
    %28 = arith.xori %24, %27 : vector<256x1xi1>
    %29 = arith.andi %28, %22 : vector<256x1xi1>
    %30 = vector.broadcast %18 : i32 to vector<256x1xi32>
    %31 = arith.addi %20, %30 : vector<256x1xi32>
    %32 = arith.select %29, %31, %20 : vector<256x1xi1>, vector<256x1xi32>
    %c0_i32_13 = arith.constant 0 : i32
    %33 = vector.broadcast %c0_i32_13 : i32 to vector<256x1xi32>
    %34 = arith.cmpi eq, %32, %33 : vector<256x1xi32>
    %c15_i32 = arith.constant 15 : i32
    %35 = vector.broadcast %c15_i32 : i32 to vector<256x1xi32>
    %36 = arith.cmpi eq, %32, %35 : vector<256x1xi32>
    %c0_14 = arith.constant 0 : index
    %c0_15 = arith.constant 0 : index
    %c0_16 = arith.constant 0 : index
    %37 = vector.load %arg1[%c0_14, %c0_15, %c0_16] : memref<1x256x32xbf16, #tpu.memory_space<vmem>>, vector<1x256x32xbf16>
    %38 = vector.shape_cast %37 : vector<1x256x32xbf16> to vector<256x32xbf16>
    %c0_17 = arith.constant 0 : index
    %c0_18 = arith.constant 0 : index
    %39 = vector.load %arg2[%c0_17, %c0_18] : memref<32x128xbf16, #tpu.memory_space<vmem>>, vector<32x128xbf16>
    %cst_19 = arith.constant dense<0.000000e+00> : vector<256x128xf32>
    %40 = tpu.matmul %38, %39, %cst_19 {dimension_numbers = #tpu.dot_dimension_numbers<[1], [0], [0], [1], [0, 0, 1, 1], [], []>} : vector<256x32xbf16>, vector<32x128xbf16>, vector<256x128xf32> -> vector<256x128xf32>
    %41 = vector.broadcast %3 : vector<1x128xf32> to vector<256x128xf32>
    %42 = arith.addf %40, %41 : vector<256x128xf32>
    %cst_20 = arith.constant 5.000000e-01 : f32
    %43 = vector.broadcast %cst_20 : f32 to vector<256x128xf32>
    %44 = arith.mulf %43, %42 : vector<256x128xf32>
    %cst_21 = arith.constant 0.707106769 : f32
    %45 = vector.broadcast %cst_21 : f32 to vector<256x128xf32>
    %46 = arith.mulf %42, %45 : vector<256x128xf32>
    %47 = math.erf %46 : vector<256x128xf32>
    %cst_22 = arith.constant 1.000000e+00 : f32
    %48 = vector.broadcast %cst_22 : f32 to vector<256x128xf32>
    %49 = arith.addf %48, %47 : vector<256x128xf32>
    %50 = arith.mulf %44, %49 : vector<256x128xf32>
    %51 = arith.truncf %50 : vector<256x128xf32> to vector<256x128xbf16>
    %c16 = arith.constant 16 : index
    %c0_23 = arith.constant 0 : index
    %52 = vector.load %arg9[%c16, %c0_23] : memref<288x128xbf16, #tpu.memory_space<vmem>>, vector<256x128xbf16>
    tpu.vector_store %arg9[%c16, %c0_23], %51 {strides = array<i32>} : memref<288x128xbf16, #tpu.memory_space<vmem>>, vector<256x128xbf16>,
    %c0_24 = arith.constant 0 : index
    %c0_25 = arith.constant 0 : index
    %53 = vector.load %arg9[%c0_24, %c0_25] : memref<288x128xbf16, #tpu.memory_space<vmem>>, vector<256x128xbf16>
    %54 = arith.extf %53 : vector<256x128xbf16> to vector<256x128xf32>
    %c16_26 = arith.constant 16 : index
    %c0_27 = arith.constant 0 : index
    %55 = vector.load %arg9[%c16_26, %c0_27] : memref<288x128xbf16, #tpu.memory_space<vmem>>, vector<256x128xbf16>
    %56 = arith.extf %55 : vector<256x128xbf16> to vector<256x128xf32>
    %c32 = arith.constant 32 : index
    %c0_28 = arith.constant 0 : index
    %57 = vector.load %arg9[%c32, %c0_28] : memref<288x128xbf16, #tpu.memory_space<vmem>>, vector<256x128xbf16>
    %58 = arith.extf %57 : vector<256x128xbf16> to vector<256x128xf32>
    %59 = vector.broadcast %7 : vector<1x128xf32> to vector<256x128xf32>
    %60 = arith.mulf %54, %59 : vector<256x128xf32>
    %61 = vector.broadcast %10 : vector<1x128xf32> to vector<256x128xf32>
    %62 = arith.mulf %56, %61 : vector<256x128xf32>
    %63 = arith.addf %60, %62 : vector<256x128xf32>
    %64 = vector.broadcast %13 : vector<1x128xf32> to vector<256x128xf32>
    %65 = arith.mulf %58, %64 : vector<256x128xf32>
    %66 = arith.addf %63, %65 : vector<256x128xf32>
    %67 = vector.broadcast %8 : vector<1x128xf32> to vector<256x128xf32>
    %68 = arith.mulf %54, %67 : vector<256x128xf32>
    %69 = vector.broadcast %11 : vector<1x128xf32> to vector<256x128xf32>
    %70 = arith.mulf %56, %69 : vector<256x128xf32>
    %71 = arith.addf %68, %70 : vector<256x128xf32>
    %72 = vector.broadcast %14 : vector<1x128xf32> to vector<256x128xf32>
    %73 = arith.mulf %58, %72 : vector<256x128xf32>
    %74 = arith.addf %71, %73 : vector<256x128xf32>
    %75 = vector.broadcast %9 : vector<1x128xf32> to vector<256x128xf32>
    %76 = arith.mulf %54, %75 : vector<256x128xf32>
    %77 = vector.broadcast %12 : vector<1x128xf32> to vector<256x128xf32>
    %78 = arith.mulf %56, %77 : vector<256x128xf32>
    %79 = arith.addf %76, %78 : vector<256x128xf32>
    %80 = vector.broadcast %15 : vector<1x128xf32> to vector<256x128xf32>
    %81 = arith.mulf %58, %80 : vector<256x128xf32>
    %82 = arith.addf %79, %81 : vector<256x128xf32>
    %c1_i32_29 = arith.constant 1 : i32
    %83 = tpu.dynamic_rotate %66 by %c1_i32_29 dim 0 : vector<256x128xf32>, i32 -> vector<256x128xf32>
    %cst_30 = arith.constant 0.000000e+00 : f32
    %84 = vector.shape_cast %34 : vector<256x1xi1> to vector<256x1xi1>
    %85 = vector.broadcast %84 : vector<256x1xi1> to vector<256x128xi1>
    %86 = vector.broadcast %cst_30 : f32 to vector<256x128xf32>
    %87 = arith.select %85, %86, %83 : vector<256x128xi1>, vector<256x128xf32>
    %c255_i32 = arith.constant 255 : i32
    %88 = tpu.dynamic_rotate %82 by %c255_i32 dim 0 : vector<256x128xf32>, i32 -> vector<256x128xf32>
    %cst_31 = arith.constant 0.000000e+00 : f32
    %89 = vector.shape_cast %36 : vector<256x1xi1> to vector<256x1xi1>
    %90 = vector.broadcast %89 : vector<256x1xi1> to vector<256x128xi1>
    %91 = vector.broadcast %cst_31 : f32 to vector<256x128xf32>
    %92 = arith.select %90, %91, %88 : vector<256x128xi1>, vector<256x128xf32>
    %93 = arith.addf %87, %74 : vector<256x128xf32>
    %94 = arith.addf %93, %92 : vector<256x128xf32>
    %95 = vector.broadcast %4 : vector<1x128xf32> to vector<256x128xf32>
    %96 = arith.addf %94, %95 : vector<256x128xf32>
    %cst_32 = arith.constant 5.000000e-01 : f32
    %97 = vector.broadcast %cst_32 : f32 to vector<256x128xf32>
    %98 = arith.mulf %97, %96 : vector<256x128xf32>
    %cst_33 = arith.constant 0.707106769 : f32
    %99 = vector.broadcast %cst_33 : f32 to vector<256x128xf32>
    %100 = arith.mulf %96, %99 : vector<256x128xf32>
    %101 = math.erf %100 : vector<256x128xf32>
    %cst_34 = arith.constant 1.000000e+00 : f32
    %102 = vector.broadcast %cst_34 : f32 to vector<256x128xf32>
    %103 = arith.addf %102, %101 : vector<256x128xf32>
    %104 = arith.mulf %98, %103 : vector<256x128xf32>
    %105 = arith.truncf %104 : vector<256x128xf32> to vector<256x128xbf16>
    %c0_35 = arith.constant 0 : index
    %c0_36 = arith.constant 0 : index
    %106 = vector.load %arg6[%c0_35, %c0_36] : memref<128x128xbf16, #tpu.memory_space<vmem>>, vector<128x128xbf16>
    %cst_37 = arith.constant dense<0.000000e+00> : vector<256x128xf32>
    %107 = tpu.matmul %105, %106, %cst_37 {dimension_numbers = #tpu.dot_dimension_numbers<[1], [0], [0], [1], [0, 0, 1, 1], [], []>} : vector<256x128xbf16>, vector<128x128xbf16>, vector<256x128xf32> -> vector<256x128xf32>
    %108 = vector.broadcast %5 : vector<1x128xf32> to vector<256x128xf32>
    %109 = arith.addf %107, %108 : vector<256x128xf32>
    %c0_38 = arith.constant 0 : index
    %c0_39 = arith.constant 0 : index
    %c0_40 = arith.constant 0 : index
    %110 = vector.load %arg8[%c0_38, %c0_39, %c0_40] : memref<1x256x128xf32, #tpu.memory_space<vmem>>, vector<1x256x128xf32>
    %111 = vector.shape_cast %110 : vector<1x256x128xf32> to vector<256x128xf32>
    %112 = vector.shape_cast %109 : vector<256x128xf32> to vector<1x256x128xf32>
    tpu.vector_store %arg8[%c0_38, %c0_39, %c0_40], %112 {strides = array<i32>} : memref<1x256x128xf32, #tpu.memory_space<vmem>>, vector<1x256x128xf32>,
    return
  }
  func.func @transform_0(%arg0: i32) -> (i32, i32, i32) {
    %c0_i32 = arith.constant 0 : i32
    %c0_i32_0 = arith.constant 0 : i32
    %c0_i32_1 = arith.constant 0 : i32
    return %arg0, %c0_i32, %c0_i32_0 : i32, i32, i32
  }
  func.func @transform_1(%arg0: i32) -> (i32, i32) {
    %c0_i32 = arith.constant 0 : i32
    %c0_i32_0 = arith.constant 0 : i32
    %c0_i32_1 = arith.constant 0 : i32
    return %c0_i32, %c0_i32_0 : i32, i32
  }
  func.func @transform_2(%arg0: i32) -> (i32, i32) {
    %c0_i32 = arith.constant 0 : i32
    %c0_i32_0 = arith.constant 0 : i32
    %c0_i32_1 = arith.constant 0 : i32
    return %c0_i32, %c0_i32_0 : i32, i32
  }
  func.func @transform_3(%arg0: i32) -> (i32, i32) {
    %c0_i32 = arith.constant 0 : i32
    %c0_i32_0 = arith.constant 0 : i32
    %c0_i32_1 = arith.constant 0 : i32
    return %c0_i32, %c0_i32_0 : i32, i32
  }
  func.func @transform_4(%arg0: i32) -> (i32, i32) {
    %c0_i32 = arith.constant 0 : i32
    %c0_i32_0 = arith.constant 0 : i32
    %c0_i32_1 = arith.constant 0 : i32
    return %c0_i32, %c0_i32_0 : i32, i32
  }
  func.func @transform_5(%arg0: i32) -> (i32, i32) {
    %c0_i32 = arith.constant 0 : i32
    %c0_i32_0 = arith.constant 0 : i32
    %c0_i32_1 = arith.constant 0 : i32
    return %c0_i32, %c0_i32_0 : i32, i32
  }
  func.func @transform_6(%arg0: i32) -> (i32, i32) {
    %c0_i32 = arith.constant 0 : i32
    %c0_i32_0 = arith.constant 0 : i32
    %c0_i32_1 = arith.constant 0 : i32
    return %c0_i32, %c0_i32_0 : i32, i32
  }
  func.func @transform_7(%arg0: i32) -> (i32, i32, i32) {
    %c0_i32 = arith.constant 0 : i32
    %c0_i32_0 = arith.constant 0 : i32
    %c0_i32_1 = arith.constant 0 : i32
    return %arg0, %c0_i32, %c0_i32_0 : i32, i32, i32
  }
}

</mosaic_0001>

<bundles_post_ra>
// kernel: tpu_custom_call.1
= control target key start
LH: loop header
LB: loop body
LE: loop exit
PB: predicated region body
PF: predicated region fallthrough
CT: control target
= control target key end

     0   :  { %12 = vsyncpa [#allocation4], 0  ;;  %s5103_s0 = inlined_call_operand.vmem [shape: bf16[2,256,32], index: 0, kind: input, shape index: {}]   ;;  %s5104_s1 = inlined_call_operand.vmem [shape: bf16[32,128], index: 1, kind: input, shape index: {}]   ;;  %s5105_s2 = inlined_call_operand.vmem [shape: f32[1,128], index: 2, kind: input, shape index: {}]   ;;  %s5106_s3 = inlined_call_operand.vmem [shape: f32[9,128], index: 3, kind: input, shape index: {}]   ;;  %s5107_s4 = inlined_call_operand.vmem [shape: f32[1,128], index: 4, kind: input, shape index: {}]   ;;  %s5108_s5 = inlined_call_operand.vmem [shape: bf16[128,128], index: 5, kind: input, shape index: {}]   ;;  %s5109_s6 = inlined_call_operand.vmem [shape: f32[1,128], index: 6, kind: input, shape index: {}]   ;;  %s5110_s7 = inlined_call_operand.hbm [shape: f32[2,256,128], index: 7, kind: output, shape index: {}]  }
   0x1   :  { %14 = vsyncpa [#allocation4 + $0x1], 0  ;;  %s3364_s24 = smov 0   ;;  %s3366_s25 = smov 0  }
   0x2   :  { %s3368_s26 = smov 0   ;;  %s3370_s27 = smov 0  }
   0x3 LB: > { %s3385_s28 = sadd.s32 4294967295, %s3318_s27   ;;  %s2856_s29 = sadd.s32 4294967294, %s3318_s27   ;;  %s3318_s27 = sphi %s3370_s27, %s5265_s27   ;;  %s3314_s26 = sphi %s3368_s26, %s5264_s26   ;;  %s3310_s25 = sphi %s3366_s25, %s5263_s25   ;;  %s3306_s24 = sphi %s3364_s24, %s5262_s24  }
   0x4   : > { %s3389_s30 = sadd.s32 1, %s3318_s27   ;;  %s179_s8 = sadd.s32 1, %s3314_s26 }
   0x5   : > { %s176_s9 = ssub.s32 %s3318_s27, %s3389_s30  ;;  %p189_p0 = scmp.ne.s32.totalorder %s3314_s26, %s3310_s25 }
   0x6   : > { %p177_p1 = scmp.eq.s32.totalorder %s176_s9, 0  ;;  %p190_p2 = scmp.eq.s32.totalorder %s3385_s28, 1 }
   0x7   : > { %p195_p3 = scmp.ne.s32.totalorder %s3310_s25, %s3306_s24  ;;  %p196_p4 = scmp.eq.s32.totalorder %s2856_s29, 1 }
   0x8   : > { %s3400_s10 = scalar_select %p177_p1, %s3314_s26, %s179_s8  }
   0x9   : > { %p3402_p5 = por %p190_p2, %p189_p0  ;;  %p3406_p6 = por %p196_p4, %p195_p3 }
   0xa   : > { %p2859_p7 = scmp.ge.s32.totalorder %s3318_s27, 1  ;;  %p240_p8 = scmp.lt.s32.totalorder %s3318_s27, 3 }
   0xc   : > { %p241_p9 = pnand %p2859_p7, %p240_p8 }
   0xe   : > { %244 = sbr.rel (%p241_p9) target bundleno = 814 (0x32e), region = 48 }
  0x15   : > { %v3100_v0 = vld [vmem:[%s5104_s1] sm:$0xff]   ;;  %p272_p10 = scmp.lt.s32.totalorder %s3385_s28, 1  ;;  %v3101_v1 = vld [vmem:[%s5104_s1 + $0x8] sm:$0xff]   ;;  %vm900_vm0 = vcmask 261120   ;;  %v3120_v20 = vld [vmem:[%s5108_s5 + $0x10] sm:$0xff]   ;;  %v285_v26 = vlaneseq  ;;  %s269_s22 = sand.u32 1, %s3310_s25  }
  0x16   : > { %2958 = vmatprep.subr.bf16.mxu0 %v3100_v0  ;;  %v3118_v18 = vld [vmem:[%s5108_s5] sm:$0xff]   ;;  %v3119_v19 = vld [vmem:[%s5108_s5 + $0x8] sm:$0xff]   ;;  %v3121_v21 = vld [vmem:[%s5108_s5 + $0x18] sm:$0xff]   ;;  %s2860_s23 = sshll.u32 %s269_s22, 8  ;;  %s2915_s13 = sshll.u32 %s3385_s28, 12 }
  0x17   : > { %s273_s17 = scalar_select %p272_p10, %s3385_s28, 1  ;;  %2959 = vmatpush3.bf16.msra.mxu0 %v3100_v0  ;;  %3042 = vmatprep.subr.bf16.mxu1 %v3118_v18  ;;  %v3122_v22 = vld [vmem:[%s5108_s5 + $0x20] sm:$0xff]   ;;  %v3123_v23 = vld [vmem:[%s5108_s5 + $0x28] sm:$0xff]   ;;  %v3124_v24 = vld [vmem:[%s5108_s5 + $0x30] sm:$0xff]   ;;  %v3481_v27 = vshrl.u32 %v285_v26, 7 }
  0x18   : > { %2960 = vmatprep.subr.bf16.mxu0 %v3101_v1  ;;  %3050 = vmatpush3.bf16.msra.mxu1 %v3118_v18  ;;  %v3125_v25 = vld [vmem:[%s5108_s5 + $0x38] sm:$0xff]   ;;  %v3486_v28 = vld [vmem:[%s5105_s2] ss:$0 sm:$0xff]  ;;  %s4987_s9 = scalar_lea.vmem [#allocation3], %s2860_s23  ;;  %s5062_s28 = scalar_lea.sflag [#allocation4], %s269_s22 }
  0x19   : > { %s2914_s18 = sshll.u32 %s273_s17, 7  ;;  %3043 = vmatprep.subr.bf16.mxu1 %v3119_v19  ;;  %v1403_v32 = vsub.s32 0, %v3481_v27  ;;  %v283_v35 = vld [vmem:[%s5106_s3] sm:$0xff]  ;;  %v1575_v36 = vsub.s32 1, %v3481_v27  ;;  %v1747_v37 = vsub.s32 2, %v3481_v27  ;;  %v3505_v41 = vadd.s32 24, %v3481_v27  ;;  %s5052_s17 = scalar_lea.hbm %s5110_s7, %s2915_s13 }
  0x1a   : > { %s3423_s21 = scalar_lea.vmem %s5103_s0, %s2914_s18  ;;  %v1439_v42 = vsub.s32 3, %v3481_v27  ;;  %v3513_v45 = vadd.s32 32, %v3481_v27  ;;  %v1507_v46 = vsub.s32 6, %v3481_v27  ;;  %v3520_v49 = vadd.s32 40, %v3481_v27  ;;  %s2794_s14 = sshll.u32 %s4987_s9, 4  ;;  %s5054_s14 = int_to_ptr.vmem [resolvable:$true] %s2794_s14 }
  0x1b   : > { %v3102_v2 = vld [vmem:[%s3423_s21] sm:$0xff]   ;;  %2961 = vmatpush3.bf16.msra.mxu0 %v3101_v1  ;;  %v3103_v3 = vld [vmem:[%s3423_s21 + $0x8] sm:$0xff]   ;;  %v3104_v4 = vld [vmem:[%s3423_s21 + $0x10] sm:$0xff]   ;;  %5140 = vst [vmem:[#allocation6_spill] sm:$0xff] %v3505_v41  ;;  %v3517_v48 = vrot.slane %v283_v35, %v1403_v32  ;;  %v3523_v51 = vrot.slane %v283_v35, %v1575_v36  ;;  %v1611_v52 = vsub.s32 4, %v3481_v27  ;;  %v3526_v53 = vrot.slane %v283_v35, %v1747_v37  ;;  %s3256_s18 = scalar_lea.vmem %s5054_s14, 4096 }
  0x1c   : > { %2962 = vmatprep.mubr.msk.bf16.mxu0 %vm900_vm0, %v3102_v2  ;;  %v3105_v5 = vld [vmem:[%s3423_s21 + $0x18] sm:$0xff]   ;;  %v3106_v6 = vld [vmem:[%s3423_s21 + $0x20] sm:$0xff]   ;;  %v3107_v7 = vld [vmem:[%s3423_s21 + $0x28] sm:$0xff]   ;;  %2994 = vmatprep.subr.bf16.mxu0 %v3118_v18  ;;  %v3529_v55 = vrot.slane %v283_v35, %v1439_v42  ;;  %v3532_v58 = vrot.slane %v283_v35, %v1507_v46  ;;  %v1679_v59 = vsub.s32 7, %v3481_v27  ;;  %v1783_v63 = vsub.s32 5, %v3481_v27  ;;  %p3257_p11 = scmp.ne.s32.totalorder %s5054_s14, %s3256_s18  ;;  %s3321_s19 = smov [#allocation3]  }
  0x1d   : > { %v3108_v8 = vld [vmem:[%s3423_s21 + $0x30] sm:$0xff]   ;;  %v3109_v9 = vld [vmem:[%s3423_s21 + $0x38] sm:$0xff]   ;;  %v3110_v10 = vld [vmem:[%s3423_s21 + $0x40] sm:$0xff]   ;;  %3051 = vmatpush3.bf16.msra.mxu1 %v3119_v19  ;;  %v3539_v0 = vadd.s32 48, %v3481_v27  ;;  %vm1949_vm2 = vcmp.lt.s32.totalorder %v3481_v27, 1  ;;  %vm2110_vm4 = vcmp.lt.s32.totalorder %v3481_v27, 7 }
  0x1e   : > { %2963 = vmatmul.mubr.msk.bf16.vlgmr.msra.gmra.mrb[0].mxu0 %vm900_vm0, %v3103_v3  ;;  %v3111_v11 = vld [vmem:[%s3423_s21 + $0x48] sm:$0xff]   ;;  %v3112_v12 = vld [vmem:[%s3423_s21 + $0x50] sm:$0xff]   ;;  %v3113_v13 = vld [vmem:[%s3423_s21 + $0x58] sm:$0xff]   ;;  %3044 = vmatprep.subr.bf16.mxu1 %v3120_v20  ;;  %v3542_v3 = vrot.slane %v283_v35, %v1611_v52  ;;  %p3258_p12 = pnand %p3257_p11, %p3402_p5  ;;  %s3260_s20 = sshll.u32 %s3321_s19, 4  ;;  %s3261_s20 = int_to_ptr.vmem [resolvable:$false] %s3260_s20 }
  0x1f   : > { %2966 = vmatprep.mubr.msk.bf16.mxu0 %vm900_vm0, %v3104_v4  ;;  %v3114_v14 = vld [vmem:[%s3423_s21 + $0x60] sm:$0xff]   ;;  %v3115_v15 = vld [vmem:[%s3423_s21 + $0x68] sm:$0xff]   ;;  %v3116_v16 = vld [vmem:[%s3423_s21 + $0x70] sm:$0xff]   ;;  %2995 = vmatpush3.bf16.msra.mxu0 %v3118_v18  ;;  %v3545_v4 = vadd.s32 56, %v3481_v27  ;;  %p3263_p0 = scmp.lt.s32.totalorder %s5054_s14, %s3261_s20 }
  0x20   : > { %v3117_v17 = vld [vmem:[%s3423_s21 + $0x78] sm:$0xff]   ;;  %2996 = vmatprep.subr.bf16.mxu0 %v3119_v19  ;;  %p3259_p13 = pneg %p3258_p12  ;;  %s3262_s21 = scalar_lea.vmem %s3261_s20, 8192 }
  0x21   : > { %3052 = vmatpush3.bf16.msra.mxu1 %v3120_v20  ;;  %p3264_p1 = scmp.lt.s32.totalorder %s3262_s21, %s3256_s18 }
  0x22   : > { %3045 = vmatprep.subr.bf16.mxu1 %v3121_v21 }
  0x23   : > { %2997 = vmatpush3.bf16.msra.mxu0 %v3119_v19  ;;  %p3265_p2 = por %p3264_p1, %p3263_p0 }
  0x24   : > { %2998 = vmatprep.subr.bf16.mxu0 %v3120_v20 }
  0x25   : > { %3053 = vmatpush3.bf16.msra.mxu1 %v3121_v21  ;;  %p3266_p3 = pnand %p3265_p2, %p3259_p13 }
  0x26   : > { %2967 = vmatmul.mubr.msk.bf16.gmra.mrb[4].mxu0 %vm900_vm0, %v3105_v5  ;;  %3046 = vmatprep.subr.bf16.mxu1 %v3122_v22  ;;  %v3548_v5 = vadd.s32 64, %v3481_v27 }
  0x27   : > { %2970 = vmatprep.mubr.msk.bf16.mxu0 %vm900_vm0, %v3106_v6  ;;  %2999 = vmatpush3.bf16.msra.mxu0 %v3120_v20  ;;  %v3568_v20 = vadd.s32 96, %v3481_v27 }
  0x28   : > { %3000 = vmatprep.subr.bf16.mxu0 %v3121_v21 }
  0x29   : > { %3054 = vmatpush3.bf16.msra.mxu1 %v3122_v22  ;;  %5144 = vst [vmem:[#allocation10_spill] sm:$0xff] %v3568_v20 }
  0x2a   : > { %3047 = vmatprep.subr.bf16.mxu1 %v3123_v23 }
  0x2b   : > { %3001 = vmatpush3.bf16.msra.mxu0 %v3121_v21 }
  0x2c   : > { %3002 = vmatprep.subr.bf16.mxu0 %v3122_v22 }
  0x2d   : > { %3055 = vmatpush3.bf16.msra.mxu1 %v3123_v23 }
  0x2e   : > { %2971 = vmatmul.mubr.msk.bf16.gmra.mrb[8].mxu0 %vm900_vm0, %v3107_v7  ;;  %3048 = vmatprep.subr.bf16.mxu1 %v3124_v24 }
  0x2f   : > { %2974 = vmatprep.mubr.msk.bf16.mxu0 %vm900_vm0, %v3108_v8  ;;  %3003 = vmatpush3.bf16.msra.mxu0 %v3122_v22 }
  0x30   : > { %3004 = vmatprep.subr.bf16.mxu0 %v3123_v23 }
  0x31   : > { %3056 = vmatpush3.bf16.msra.mxu1 %v3124_v24 }
  0x32   : > { %3049 = vmatprep.subr.bf16.mxu1 %v3125_v25 }
  0x33   : > { %3005 = vmatpush3.bf16.msra.mxu0 %v3123_v23 }
  0x34   : > { %3006 = vmatprep.subr.bf16.mxu0 %v3124_v24 }
  0x35   : > { %3057 = vmatpush3.bf16.msra.mxu1 %v3125_v25 }
  0x36   : > { %2975 = vmatmul.mubr.msk.bf16.gmra.mrb[12].mxu0 %vm900_vm0, %v3109_v9  ;;  %v3552_v9 = vadd.s32 72, %v3481_v27 }
  0x37   : > { %2978 = vmatprep.mubr.msk.bf16.mxu0 %vm900_vm0, %v3110_v10  ;;  %3007 = vmatpush3.bf16.msra.mxu0 %v3124_v24  ;;  %v3555_v10 = vadd.s32 80, %v3481_v27 }
  0x38   : > { %3008 = vmatprep.subr.bf16.mxu0 %v3125_v25  ;;  %5141 = vst [vmem:[#allocation7_spill] sm:$0xff] %v3552_v9 }
  0x39   : > { %5142 = vst [vmem:[#allocation8_spill] sm:$0xff] %v3555_v10 }
  0x3b   : > { %3009 = vmatpush3.bf16.msra.mxu0 %v3125_v25 }
  0x3e   : > { %2979 = vmatmul.mubr.msk.bf16.gmra.mrb[16].mxu0 %vm900_vm0, %v3111_v11 }
  0x3f   : > { %2982 = vmatprep.mubr.msk.bf16.mxu0 %vm900_vm0, %v3112_v12 }
  0x46   : > { %2983 = vmatmul.mubr.msk.bf16.gmra.mrb[20].mxu0 %vm900_vm0, %v3113_v13  ;;  %v3558_v13 = vrot.slane %v283_v35, %v1679_v59 }
  0x47   : > { %2986 = vmatprep.mubr.msk.bf16.mxu0 %vm900_vm0, %v3114_v14  ;;  %v3561_v14 = vadd.s32 88, %v3481_v27 }
  0x49   : > { %5143 = vst [vmem:[#allocation9_spill] sm:$0xff] %v3561_v14 }
  0x4e   : > { %2987 = vmatmul.mubr.msk.bf16.gmra.mrb[24].mxu0 %vm900_vm0, %v3115_v15 }
  0x4f   : > { %2990 = vmatprep.mubr.msk.bf16.mxu0 %vm900_vm0, %v3116_v16  ;;  %v3563_v16 = vrot.slane %v283_v35, %v1783_v63 }
  0x56   : > { %2991 = vmatmul.mubr.msk.bf16.gmra.mrb[28].mxu0 %vm900_vm0, %v3117_v17 }
  0xf1   : > { %v2964_v29 = vpop.f32.mrb[0].mxu0 }
  0xf2   : > { %v3489_v30 = vadd.f32 %v2964_v29, %v3486_v28  ;;  %v983_v31 = vpop.f32.mrb[1].mxu0 }
  0xf3   : > { %v3493_v33 = vadd.f32 %v3486_v28, %v983_v31  ;;  %v2965_v34 = vpop.f32.mrb[2].mxu0 }
  0xf4   : > { %v1144_v38 = vmul.f32 0.70710677, %v3489_v30  ;;  %v3502_v39 = vadd.f32 %v2965_v34, %v3486_v28  ;;  %v986_v40 = vpop.f32.mrb[3].mxu0  ;;  %v1112_v26 = vmul.f32 0.5, %v3489_v30 }
  0xf5   : > { %v1142_v43 = vmul.f32 0.70710677, %v3493_v33  ;;  %v3510_v44 = vadd.f32 %v3486_v28, %v986_v40  ;;  %v1110_v35 = vmul.f32 0.5, %v3493_v33  ;;  %v3582_v33 = vadd.s32 104, %v3481_v27 }
  0xf6   : > { %3126 = verf.f32 %v1144_v38  ;;  %v1145_v47 = vmul.f32 0.70710677, %v3502_v39  ;;  %v1113_v37 = vmul.f32 0.5, %v3502_v39 }
  0xf7   : > { %3128 = verf.f32 %v1142_v43  ;;  %v1143_v50 = vmul.f32 0.70710677, %v3510_v44  ;;  %v1111_v46 = vmul.f32 0.5, %v3510_v44  ;;  %5145 = vst [vmem:[#allocation11_spill] sm:$0xff] %v3582_v33 }
  0xf8   : > { %3130 = verf.f32 %v1145_v47 }
  0xf9   : > { %3132 = verf.f32 %v1143_v50  ;;  %v2968_v56 = vpop.f32.mrb[4].mxu0 }
  0xfa   : > { %v1008_v60 = vadd.f32 %v2968_v56, %v3486_v28  ;;  %v999_v61 = vpop.f32.mrb[5].mxu0 }
  0xfb   : > { %v1000_v1 = vadd.f32 %v3486_v28, %v999_v61  ;;  %v2969_v2 = vpop.f32.mrb[6].mxu0 }
  0xfc   : > { %v1148_v6 = vmul.f32 0.70710677, %v1008_v60  ;;  %v1011_v7 = vadd.f32 %v2969_v2, %v3486_v28  ;;  %v1002_v8 = vpop.f32.mrb[7].mxu0  ;;  %v1116_v56 = vmul.f32 0.5, %v1008_v60 }
  0xfd   : > { %v1146_v11 = vmul.f32 0.70710677, %v1000_v1  ;;  %v1003_v12 = vadd.f32 %v3486_v28, %v1002_v8 }
  0xfe   : > { %3134 = verf.f32 %v1148_v6  ;;  %v1149_v15 = vmul.f32 0.70710677, %v1011_v7 }
  0xff   : > { %3136 = verf.f32 %v1146_v11  ;;  %v1147_v18 = vmul.f32 0.70710677, %v1003_v12 }
 0x100   : > { %v3127_v21 = vpop.eup %3126  ;;  %3138 = verf.f32 %v1149_v15 }
 0x101   : > { %v3129_v25 = vpop.eup %3128  ;;  %v1208_v29 = vadd.f32 1.0, %v3127_v21  ;;  %3140 = verf.f32 %v1147_v18  ;;  %v2972_v31 = vpop.f32.mrb[8].mxu0  ;;  %v1114_v18 = vmul.f32 0.5, %v1000_v1 }
 0x102   : > { %v3131_v34 = vpop.eup %3130  ;;  %v1206_v36 = vadd.f32 1.0, %v3129_v25  ;;  %v1024_v38 = vadd.f32 %v2972_v31, %v3486_v28  ;;  %v1015_v40 = vpop.f32.mrb[9].mxu0  ;;  %v1117_v31 = vmul.f32 0.5, %v1011_v7 }
 0x103   : > { %v3133_v42 = vpop.eup %3132  ;;  %v1209_v43 = vadd.f32 1.0, %v3131_v34  ;;  %v1016_v30 = vadd.f32 %v3486_v28, %v1015_v40  ;;  %v2973_v47 = vpop.f32.mrb[10].mxu0  ;;  %v1240_v39 = vmul.f32 %v1208_v29, %v1112_v26  ;;  %v1115_v34 = vmul.f32 0.5, %v1003_v12 }
 0x104   : > { %v1207_v52 = vadd.f32 1.0, %v3133_v42  ;;  %v1152_v59 = vmul.f32 0.70710677, %v1024_v38  ;;  %v1018_v61 = vpop.f32.mrb[11].mxu0  ;;  %v1027_v6 = vadd.f32 %v2973_v47, %v3486_v28  ;;  %v1238_v8 = vmul.f32 %v1206_v36, %v1110_v35 }
 0x105   : > { %v1241_v63 = vmul.f32 %v1209_v43, %v1113_v37  ;;  %v1150_v2 = vmul.f32 0.70710677, %v1016_v30  ;;  %v1019_v44 = vadd.f32 %v3486_v28, %v1018_v61  ;;  %v3586_v29 = vmul.f32 0.5, %v1024_v38 }
 0x106   : > { %v1239_v11 = vmul.f32 %v1207_v52, %v1111_v46  ;;  %3142 = verf.f32 %v1152_v59  ;;  %v1153_v21 = vmul.f32 0.70710677, %v1027_v6  ;;  %v3591_v46 = vmul.f32 0.5, %v1016_v30 }
 0x107   : > { %v1271_v15 = vpack.c.bf16 %v1241_v63, %v1240_v39  ;;  %3144 = verf.f32 %v1150_v2  ;;  %v1151_v40 = vmul.f32 0.70710677, %v1019_v44  ;;  %v1121_v1 = vmul.f32 0.5, %v1027_v6 }
 0x108   : > { %v3135_v60 = vpop.eup %3134  ;;  %v1270_v25 = vpack.c.bf16 %v1239_v11, %v1238_v8  ;;  %3146 = verf.f32 %v1153_v21  ;;  %v1119_v8 = vmul.f32 0.5, %v1019_v44 }
 0x109   : > { %v3137_v42 = vpop.eup %3136  ;;  %v1212_v26 = vadd.f32 1.0, %v3135_v60  ;;  %v2976_v37 = vpop.f32.mrb[12].mxu0  ;;  %3148 = verf.f32 %v1151_v40  ;;  %v3595_v39 = vunpack.c.l.bf16 %v1271_v15  ;;  %v3597_v63 = vunpack.c.h.bf16 %v1271_v15 }
 0x10a   : > { %v3139_v36 = vpop.eup %3138  ;;  %v3589_v43 = vunpack.c.l.bf16 %v1270_v25  ;;  %v1031_v47 = vpop.f32.mrb[13].mxu0  ;;  %v1210_v7 = vadd.f32 1.0, %v3137_v42  ;;  %v1040_v59 = vadd.f32 %v2976_v37, %v3486_v28  ;;  %v3599_v2 = vunpack.c.h.bf16 %v1270_v25 }
 0x10b   : > { %v3141_v52 = vpop.eup %3140  ;;  %v1213_v12 = vadd.f32 1.0, %v3139_v36  ;;  %v1032_v38 = vadd.f32 %v3486_v28, %v1031_v47  ;;  %v2977_v61 = vpop.f32.mrb[14].mxu0  ;;  %5147 = vst [vmem:[#allocation13_spill] sm:$0xff] %v3595_v39  ;;  %5148 = vst [vmem:[#allocation14_spill] sm:$0xff] %v3597_v63  ;;  %v1244_v11 = vmul.f32 %v1212_v26, %v1116_v56 }
 0x10c   : > { %5146 = vst [vmem:[#allocation12_spill] sm:$0xff] %v3589_v43  ;;  %5149 = vst [vmem:[#allocation15_spill] sm:$0xff] %v3599_v2  ;;  %v1034_v30 = vpop.f32.mrb[15].mxu0  ;;  %v3603_v6 = vmul.f32 %v3517_v48, %v3589_v43  ;;  %v1211_v60 = vadd.f32 1.0, %v3141_v52  ;;  %v3607_v40 = vmul.f32 %v3523_v51, %v3589_v43  ;;  %v1156_v42 = vmul.f32 0.70710677, %v1040_v59 }
 0x10d   : > { %v1245_v21 = vmul.f32 %v1213_v12, %v1117_v31  ;;  %v1154_v37 = vmul.f32 0.70710677, %v1032_v38  ;;  %v1043_v15 = vadd.f32 %v2977_v61, %v3486_v28  ;;  %v1242_v36 = vmul.f32 %v1210_v7, %v1114_v18 }
 0x10e   : > { %5150 = vst [vmem:[#allocation16_spill] sm:$0xff] %v3607_v40  ;;  %v1243_v47 = vmul.f32 %v1211_v60, %v1115_v34  ;;  %v1035_v44 = vadd.f32 %v3486_v28, %v1034_v30  ;;  %v3613_v35 = vmul.f32 %v3523_v51, %v3599_v2  ;;  %v3617_v56 = vmul.f32 %v3526_v53, %v3599_v2 }
 0x10f   : > { %v1273_v25 = vpack.c.bf16 %v1245_v21, %v1244_v11  ;;  %3150 = verf.f32 %v1156_v42  ;;  %v1157_v31 = vmul.f32 0.70710677, %v1043_v15  ;;  %v3619_v12 = vmul.f32 0.5, %v1040_v59 }
 0x110   : > { %v3143_v54 = vpop.eup %3142  ;;  %5151 = vst [vmem:[#allocation17_spill] sm:$0xff] %v3613_v35  ;;  %v1272_v52 = vpack.c.bf16 %v1243_v47, %v1242_v36  ;;  %v3621_v18 = vmul.f32 0.5, %v1032_v38  ;;  %v3625_v7 = vmul.f32 %v3517_v48, %v3599_v2  ;;  %3152 = verf.f32 %v1154_v37 }
 0x111   : > { %v3145_v26 = vpop.eup %3144  ;;  %v2980_v34 = vpop.f32.mrb[16].mxu0  ;;  %v1216_v61 = vadd.f32 1.0, %v3143_v54  ;;  %v3627_v30 = vmul.f32 0.5, %v1043_v15  ;;  %v1155_v11 = vmul.f32 0.70710677, %v1035_v44  ;;  %v3629_v42 = vunpack.c.l.bf16 %v1273_v25 }
 0x112   : > { %v1047_v21 = vpop.f32.mrb[17].mxu0  ;;  %v3147_v60 = vpop.eup %3146  ;;  %v1214_v50 = vadd.f32 1.0, %v3145_v26  ;;  %3154 = verf.f32 %v1157_v31  ;;  %v3633_v38 = vmul.f32 %v3517_v48, %v3595_v39  ;;  %v3635_v47 = vunpack.c.h.bf16 %v1273_v25 }
 0x113   : > { %v2981_v59 = vpop.f32.mrb[18].mxu0  ;;  %v3149_v36 = vpop.eup %3148  ;;  %v1217_v32 = vadd.f32 1.0, %v3147_v60  ;;  %3156 = verf.f32 %v1155_v11  ;;  %v1056_v54 = vadd.f32 %v2980_v34, %v3486_v28  ;;  %v1048_v24 = vadd.f32 %v3486_v28, %v1047_v21 }
 0x114   : > { %v1050_v37 = vpop.f32.mrb[19].mxu0  ;;  %v1215_v15 = vadd.f32 1.0, %v3149_v36  ;;  %v1059_v23 = vadd.f32 %v2981_v59, %v3486_v28  ;;  %v1248_v26 = vmul.f32 %v1216_v61, %v3586_v29  ;;  %v1123_v19 = vmul.f32 0.5, %v1035_v44 }
 0x115   : > { %v1051_v31 = vadd.f32 %v3486_v28, %v1050_v37  ;;  %v1249_v22 = vmul.f32 %v1217_v32, %v1121_v1  ;;  %v1160_v17 = vmul.f32 0.70710677, %v1056_v54  ;;  %v3642_v62 = vunpack.c.l.bf16 %v1272_v52 }
 0x116   : > { %v1246_v25 = vmul.f32 %v1214_v50, %v3591_v46  ;;  %v1247_v11 = vmul.f32 %v1215_v15, %v1119_v8  ;;  %v1158_v60 = vmul.f32 0.70710677, %v1048_v24  ;;  %v3645_v34 = vunpack.c.h.bf16 %v1272_v52 }
 0x117   : > { %v1275_v36 = vpack.c.bf16 %v1249_v22, %v1248_v26  ;;  %3158 = verf.f32 %v1160_v17  ;;  %v1161_v21 = vmul.f32 0.70710677, %v1059_v23  ;;  %v3647_v59 = vmul.f32 0.5, %v1056_v54 }
 0x118   : > { %5152 = vst [vmem:[#allocation18_spill] sm:$0xff] %v3645_v34  ;;  %v1274_v57 = vpack.c.bf16 %v1247_v11, %v1246_v25  ;;  %3160 = verf.f32 %v1158_v60  ;;  %v1159_v37 = vmul.f32 0.70710677, %v1051_v31  ;;  %v3649_v1 = vmul.f32 0.5, %v1048_v24 }
 0x119   : > { %v2984_v29 = vpop.f32.mrb[20].mxu0  ;;  %v3151_v32 = vpop.eup %3150  ;;  %3162 = verf.f32 %v1161_v21  ;;  %v3654_v46 = vmul.f32 %v3517_v48, %v3597_v63  ;;  %v1129_v22 = vmul.f32 0.5, %v1059_v23  ;;  %v3656_v17 = vmul.f32 0.5, %v1051_v31 }
 0x11a   : > { %v1072_v44 = vadd.f32 %v2984_v29, %v3486_v28  ;;  %v1063_v50 = vpop.f32.mrb[21].mxu0  ;;  %3164 = verf.f32 %v1159_v37  ;;  %v1443_v52 = vmul.f32 %v3529_v55, %v3595_v39  ;;  %v3153_v61 = vpop.eup %3152  ;;  %v1220_v54 = vadd.f32 1.0, %v3151_v32 }
 0x11b   : > { %v2985_v8 = vpop.f32.mrb[22].mxu0  ;;  %v1064_v15 = vadd.f32 %v3486_v28, %v1063_v50  ;;  %v3662_v60 = vunpack.c.l.bf16 %v1275_v36  ;;  %v3664_v21 = vunpack.c.h.bf16 %v1275_v36  ;;  %v1218_v23 = vadd.f32 1.0, %v3153_v61 }
 0x11c   : > { %v1164_v24 = vmul.f32 0.70710677, %v1072_v44  ;;  %v1075_v26 = vadd.f32 %v2985_v8, %v3486_v28  ;;  %v1066_v25 = vpop.f32.mrb[23].mxu0  ;;  %v3155_v11 = vpop.eup %3154  ;;  %v3667_v29 = vunpack.c.l.bf16 %v1274_v57  ;;  %v3669_v40 = vunpack.c.h.bf16 %v1274_v57 }
 0x11d   : > { %v1067_v31 = vadd.f32 %v3486_v28, %v1066_v25  ;;  %v3157_v37 = vpop.eup %3156  ;;  %v1221_v35 = vadd.f32 1.0, %v3155_v11  ;;  %v1162_v32 = vmul.f32 0.70710677, %v1064_v15  ;;  %v3671_v2 = vmul.f32 0.5, %v1072_v44 }
 0x11e   : > { %3166 = verf.f32 %v1164_v24  ;;  %v1219_v50 = vadd.f32 1.0, %v3157_v37  ;;  %v1165_v8 = vmul.f32 0.70710677, %v1075_v26  ;;  %v1252_v43 = vmul.f32 %v1220_v54, %v3619_v12 }
 0x11f   : > { %v1253_v36 = vmul.f32 %v1221_v35, %v3627_v30  ;;  %3168 = verf.f32 %v1162_v32  ;;  %v1163_v61 = vmul.f32 0.70710677, %v1067_v31  ;;  %v1250_v25 = vmul.f32 %v1218_v23, %v3621_v18 }
 0x120   : > { %v1251_v41 = vmul.f32 %v1219_v50, %v1123_v19  ;;  %3170 = verf.f32 %v1165_v8  ;;  %v1444_v24 = vmul.f32 %v3529_v55, %v3597_v63  ;;  %v3678_v37 = vmul.f32 0.5, %v1064_v15 }
 0x121   : > { %v2988_v33 = vpop.f32.mrb[24].mxu0  ;;  %v3159_v57 = vpop.eup %3158  ;;  %v1277_v11 = vpack.c.bf16 %v1253_v36, %v1252_v43  ;;  %3172 = verf.f32 %v1163_v61  ;;  %v1133_v32 = vmul.f32 0.5, %v1075_v26  ;;  %v1131_v8 = vmul.f32 0.5, %v1067_v31 }
 0x122   : > { %v1088_v44 = vadd.f32 %v2988_v33, %v3486_v28  ;;  %v1079_v12 = vpop.f32.mrb[25].mxu0  ;;  %v3161_v54 = vpop.eup %3160  ;;  %v1276_v35 = vpack.c.bf16 %v1251_v41, %v1250_v25  ;;  %v1224_v30 = vadd.f32 1.0, %v3159_v57  ;;  %v1445_v43 = vmul.f32 %v3529_v55, %v3642_v62 }
 0x123   : > { %v1080_v18 = vadd.f32 %v3486_v28, %v1079_v12  ;;  %v2989_v19 = vpop.f32.mrb[26].mxu0  ;;  %v3163_v23 = vpop.eup %3162  ;;  %v1222_v50 = vadd.f32 1.0, %v3161_v54  ;;  %v1446_v15 = vmul.f32 %v3529_v55, %v3645_v34  ;;  %v3686_v33 = vunpack.c.l.bf16 %v1277_v11 }
 0x124   : > { %v1082_v20 = vpop.f32.mrb[27].mxu0  ;;  %v3165_v36 = vpop.eup %3164  ;;  %v1225_v61 = vadd.f32 1.0, %v3163_v23  ;;  %v3689_v41 = vadd.f32 %v1443_v52, %v3603_v6  ;;  %v3692_v26 = vadd.f32 %v1444_v24, %v3625_v7  ;;  %v3694_v25 = vunpack.c.h.bf16 %v1277_v11 }
 0x125   : > { %5153 = vst [vmem:[#allocation19_spill] sm:$0xff] %v3686_v33  ;;  %v1256_v31 = vmul.f32 %v1224_v30, %v3647_v59  ;;  %v1223_v57 = vadd.f32 1.0, %v3165_v36  ;;  %v1168_v12 = vmul.f32 0.70710677, %v1088_v44  ;;  %v1166_v14 = vmul.f32 0.70710677, %v1080_v18 }
 0x126   : > { %5154 = vst [vmem:[#allocation20_spill] sm:$0xff] %v3694_v25  ;;  %v1257_v54 = vmul.f32 %v1225_v61, %v1129_v22  ;;  %v1091_v10 = vadd.f32 %v2989_v19, %v3486_v28  ;;  %v1083_v9 = vadd.f32 %v3486_v28, %v1082_v20  ;;  %v1254_v23 = vmul.f32 %v1222_v50, %v3649_v1 }
 0x127   : > { %v1255_v6 = vmul.f32 %v1223_v57, %v3656_v17  ;;  %v3701_v52 = vmul.f32 0.5, %v1088_v44  ;;  %3174 = verf.f32 %v1168_v12  ;;  %v3703_v7 = vunpack.c.l.bf16 %v1276_v35 }
 0x128   : > { %v3167_v33 = vpop.eup %3166  ;;  %v1279_v24 = vpack.c.bf16 %v1257_v54, %v1256_v31  ;;  %3176 = verf.f32 %v1166_v14  ;;  %v3705_v30 = vunpack.c.h.bf16 %v1276_v35  ;;  %v1169_v36 = vmul.f32 0.70710677, %v1091_v10 }
 0x129   : > { %v1228_v59 = vadd.f32 1.0, %v3167_v33  ;;  %v2992_v11 = vpop.f32.mrb[28].mxu0  ;;  %v3169_v22 = vpop.eup %3168  ;;  %v1278_v19 = vpack.c.bf16 %v1255_v6, %v1254_v23  ;;  %v1167_v20 = vmul.f32 0.70710677, %v1083_v9  ;;  %v1134_v50 = vmul.f32 0.5, %v1080_v18 }
 0x12a   : > { %5155 = vst [vmem:[#allocation21_spill] sm:$0xff] %v3705_v30  ;;  %v1095_v61 = vpop.f32.mrb[29].mxu0  ;;  %v3171_v25 = vpop.eup %3170  ;;  %v1226_v1 = vadd.f32 1.0, %v3169_v22  ;;  %v1477_v44 = vadd.f32 %v1445_v43, %v3633_v38  ;;  %v1478_v57 = vadd.f32 %v1446_v15, %v3654_v46  ;;  %v1137_v33 = vmul.f32 0.5, %v1091_v10 }
 0x12b   : > { %v2993_v17 = vpop.f32.mrb[30].mxu0  ;;  %v3173_v12 = vpop.eup %3172  ;;  %v1229_v31 = vadd.f32 1.0, %v3171_v25  ;;  %3178 = verf.f32 %v1169_v36  ;;  %v1135_v14 = vmul.f32 0.5, %v1083_v9  ;;  %v1260_v35 = vmul.f32 %v1228_v59, %v3671_v2 }
 0x12c   : > { %v1098_v54 = vpop.f32.mrb[31].mxu0  ;;  %v1227_v23 = vadd.f32 1.0, %v3173_v12  ;;  %3180 = verf.f32 %v1167_v20  ;;  %v1104_v6 = vadd.f32 %v2992_v11, %v3486_v28  ;;  %v1096_v18 = vadd.f32 %v3486_v28, %v1095_v61 }
 0x12d   : > { %v1261_v30 = vmul.f32 %v1229_v31, %v1133_v32  ;;  %v1107_v22 = vadd.f32 %v2993_v17, %v3486_v28  ;;  %v1099_v38 = vadd.f32 %v3486_v28, %v1098_v54  ;;  %v3714_v46 = vunpack.c.l.bf16 %v1279_v24 }
 0x12e   : > { %v1258_v10 = vmul.f32 %v1226_v1, %v3678_v37  ;;  %v1259_v43 = vmul.f32 %v1227_v23, %v1131_v8  ;;  %v1172_v9 = vmul.f32 0.70710677, %v1104_v6  ;;  %v3717_v15 = vunpack.c.h.bf16 %v1279_v24 }
 0x12f   : > { %v3719_v2 = vunpack.c.l.bf16 %v1278_v19  ;;  %v1281_v25 = vpack.c.bf16 %v1261_v30, %v1260_v35  ;;  %v1170_v59 = vmul.f32 0.70710677, %v1096_v18  ;;  %v3721_v11 = vunpack.c.h.bf16 %v1278_v19 }
 0x130   : > { %v1280_v32 = vpack.c.bf16 %v1259_v43, %v1258_v10  ;;  %3182 = verf.f32 %v1172_v9  ;;  %v1173_v36 = vmul.f32 0.70710677, %v1107_v22  ;;  %v1140_v61 = vmul.f32 0.5, %v1104_v6 }
 0x131   : > { %v3175_v20 = vpop.eup %3174  ;;  %3184 = verf.f32 %v1170_v59  ;;  %v1171_v28 = vmul.f32 0.70710677, %v1099_v38  ;;  %v1511_v37 = vmul.f32 %v3532_v58, %v3642_v62  ;;  %v1138_v24 = vmul.f32 0.5, %v1096_v18 }
 0x132   : > { %v3177_v8 = vpop.eup %3176  ;;  %v1232_v1 = vadd.f32 1.0, %v3175_v20  ;;  %v1141_v17 = vmul.f32 0.5, %v1107_v22  ;;  %3186 = verf.f32 %v1173_v36  ;;  %v1139_v30 = vmul.f32 0.5, %v1099_v38 }
 0x133   : > { %v1230_v12 = vadd.f32 1.0, %v3177_v8  ;;  %3188 = verf.f32 %v1171_v28  ;;  %v1512_v19 = vmul.f32 %v3532_v58, %v3645_v34  ;;  %v3727_v31 = vunpack.c.l.bf16 %v1281_v25 }
 0x134   : > { %v3729_v54 = vunpack.c.h.bf16 %v1281_v25  ;;  %v3731_v35 = vunpack.c.l.bf16 %v1280_v32  ;;  %v3733_v23 = vunpack.c.h.bf16 %v1280_v32  ;;  %v1264_v10 = vmul.f32 %v1232_v1, %v3701_v52 }
 0x135   : > { %5156 = vst [vmem:[#allocation22_spill] sm:$0xff] %v3727_v31  ;;  %v3179_v6 = vpop.eup %3178  ;;  %v1513_v18 = vmul.f32 %v3532_v58, %v3629_v42  ;;  %v1514_v22 = vmul.f32 %v3532_v58, %v3635_v47  ;;  %v3741_v38 = vadd.f32 %v1511_v37, %v3689_v41  ;;  %v1581_v25 = vmul.f32 %v3523_v51, %v3595_v39 }
 0x136   : > { %5157 = vst [vmem:[#allocation23_spill] sm:$0xff] %v3729_v54  ;;  %5158 = vst [vmem:[#allocation24_spill] sm:$0xff] %v3733_v23  ;;  %v3181_v43 = vpop.eup %3180  ;;  %v1233_v9 = vadd.f32 1.0, %v3179_v6  ;;  %v1617_v59 = vmul.f32 %v3542_v3, %v3642_v62  ;;  %v1618_v52 = vmul.f32 %v3542_v3, %v3645_v34  ;;  %v1262_v32 = vmul.f32 %v1230_v12, %v1134_v50 }
 0x137   : > { %5159 = vst [vmem:[#allocation25_spill] sm:$0xff] %v3741_v38  ;;  %v1231_v36 = vadd.f32 1.0, %v3181_v43  ;;  %v3750_v20 = vadd.f32 %v1512_v19, %v3692_v26  ;;  %v1582_v41 = vmul.f32 %v3523_v51, %v3597_v63  ;;  %v1545_v37 = vadd.f32 %v1513_v18, %v1477_v44 }
 0x138   : > { %v1265_v28 = vmul.f32 %v1233_v9, %v1137_v33  ;;  %v3754_v8 = vadd.f32 %v1514_v22, %v1478_v57  ;;  %v1649_v1 = vadd.f32 %v1617_v59, %v1581_v25  ;;  %v1685_v31 = vmul.f32 %v3558_v13, %v3629_v42 }
 0x139   : > { %v1263_v6 = vmul.f32 %v1231_v36, %v1135_v14  ;;  %v1650_v54 = vadd.f32 %v1618_v52, %v1582_v41  ;;  %v1789_v50 = vmul.f32 %v3563_v16, %v3642_v62  ;;  %v5160_v26 = vand.u32 15, %v3513_v45 }
 0x13a   : > { %v3183_v12 = vpop.eup %3182  ;;  %v1283_v43 = vpack.c.bf16 %v1265_v28, %v1264_v10  ;;  %v1686_v44 = vmul.f32 %v3558_v13, %v3635_v47  ;;  %v1755_v57 = vmul.f32 %v3526_v53, %v3642_v62  ;;  %v1790_v33 = vmul.f32 %v3563_v16, %v3645_v34 }
 0x13b   : > { %vm3762_vm1 = vcmp.eq.s32.totalorder %v5160_v26, 0  ;;  %v3185_v14 = vpop.eup %3184  ;;  %v1282_v18 = vpack.c.bf16 %v1263_v6, %v1262_v32  ;;  %v1236_v10 = vadd.f32 1.0, %v3183_v12  ;;  %v1753_v45 = vmul.f32 %v3526_v53, %v3595_v39 }
 0x13c   : > { %v1791_v22 = vmul.f32 %v3563_v16, %v3629_v42  ;;  %v3187_v9 = vpop.eup %3186  ;;  %v1234_v25 = vadd.f32 1.0, %v3185_v14  ;;  %v1717_v59 = vadd.f32 %v1685_v31, %v1649_v1  ;;  %v1754_v52 = vmul.f32 %v3526_v53, %v3597_v63  ;;  %v3790_v31 = vld [vmem:[%s5106_s3 + $0x8] ss:$0 sm:$0xff] }
 0x13d   : > { %v1788_v36 = vmul.f32 %v3563_v16, %v3597_v63  ;;  %v3189_v41 = vpop.eup %3188  ;;  %v1268_v28 = vmul.f32 %v1236_v10, %v1140_v61  ;;  %v1237_v26 = vadd.f32 1.0, %v3187_v9  ;;  %v5163_v32 = vand.u32 15, %v3520_v49 }
 0x13e   : > { %v1718_v12 = vadd.f32 %v1686_v44, %v1650_v54  ;;  %v1821_v39 = vadd.f32 %v1789_v50, %v1753_v45  ;;  %v1266_v23 = vmul.f32 %v1234_v25, %v1138_v24  ;;  %v1235_v14 = vadd.f32 1.0, %v3189_v41 }
 0x13f   : > { %vm3783_vm3 = vcmp.eq.s32.totalorder %v5163_v32, 15  ;;  %v1822_v1 = vadd.f32 %v1790_v33, %v1754_v52  ;;  %v1823_v63 = vadd.f32 %v1791_v22, %v1755_v57  ;;  %v1269_v61 = vmul.f32 %v1237_v26, %v1141_v17 }
 0x140   : > { %v1856_v49 = vmul.f32 %v3790_v31, %v3645_v34  ;;  %v1857_v10 = vmul.f32 %v3790_v31, %v3629_v42  ;;  %v1858_v24 = vmul.f32 %v3790_v31, %v3635_v47  ;;  %v1267_v54 = vmul.f32 %v1235_v14, %v1139_v30 }
 0x141   : > { %v1859_v50 = vmul.f32 %v3790_v31, %v3667_v29  ;;  %v5131_v44 = vrot.slane %v3741_v38, 7  ;;  %v1920_v57 = vrot.slane %v3750_v20, 7  ;;  %v1285_v33 = vpack.c.bf16 %v1269_v61, %v1268_v28 }
 0x142   : > { %v1820_v17 = vadd.f32 %v1788_v36, %v3617_v56  ;;  %v3804_v45 = vadd.f32 %v1857_v10, %v1821_v39  ;;  %v1890_v22 = vadd.f32 %v1858_v24, %v1822_v1  ;;  %v3806_v9 = vpack.c.bf16 %v1267_v54, %v1266_v23 }
 0x143   : > { %v3808_v25 = vadd.f32 %v1859_v50, %v1823_v63  ;;  %v1921_v52 = vrot.slane %v1545_v37, 7  ;;  %v1922_v30 = vrot.slane %v3754_v8, 7  ;;  %v3811_v41 = vunpack.c.l.bf16 %v1283_v43 }
 0x144   : > { %v3813_v26 = vunpack.c.h.bf16 %v1283_v43  ;;  %v3815_v32 = vunpack.c.l.bf16 %v1282_v18  ;;  %v3821_v39 = vsel %vm1949_vm2, %v5131_v44, %v1920_v57  ;;  %v3823_v56 = vunpack.c.h.bf16 %v1282_v18 }
 0x145   : > { %5166 = vst [vmem:[#allocation26_spill] sm:$0xff] %v3821_v39  ;;  %v3825_v23 = vadd.f32 %v1856_v49, %v1820_v17  ;;  %v1976_v63 = vsel %vm1949_vm2, %v1921_v52, %v1922_v30  ;;  %v1977_v20 = vsel %vm1949_vm2, %v1920_v57, %v1921_v52  ;;  %v5132_v43 = vrot.slane %v3804_v45, 1 }
 0x146   : > { %v2050_v37 = vsel %vm3762_vm1, 0.0, %v1977_v20  ;;  %v2083_v36 = vrot.slane %v1890_v22, 1  ;;  %v5133_v28 = vrot.slane %v3808_v25, 1  ;;  %v3837_v18 = vunpack.c.l.bf16 %v1285_v33 }
 0x147   : > { %v2243_v14 = vadd.f32 %v2050_v37, %v1717_v59  ;;  %v1411_v1 = vmul.f32 %v3517_v48, %v3642_v62  ;;  %v1412_v61 = vmul.f32 %v3517_v48, %v3645_v34  ;;  %v2244_v10 = vadd.f32 %v1976_v63, %v1718_v12  ;;  %v3868_v12 = vld [vmem:[%s5107_s4] ss:$0 sm:$0xff] }
 0x148   : > { %v2136_v19 = vsel %vm2110_vm4, %v2083_v36, %v5133_v28  ;;  %v2137_v49 = vsel %vm2110_vm4, %v5132_v43, %v2083_v36  ;;  %v1447_v59 = vmul.f32 %v3529_v55, %v3629_v42  ;;  %v3853_v24 = vunpack.c.h.bf16 %v1285_v33 }
 0x149   : > { %v2212_v54 = vsel %vm3783_vm3, 0.0, %v2136_v19  ;;  %v2275_v50 = vadd.f32 %v2243_v14, %v2137_v49  ;;  %v5167_v57 = vand.u32 15, %v3539_v0  ;;  %v1448_v22 = vmul.f32 %v3529_v55, %v3635_v47 }
 0x14a   : > { %v2276_v33 = vadd.f32 %v2244_v10, %v2212_v54  ;;  %v1479_v52 = vadd.f32 %v1447_v59, %v1411_v1  ;;  %v1515_v6 = vmul.f32 %v3532_v58, %v3667_v29  ;;  %v1516_v0 = vmul.f32 %v3532_v58, %v3669_v40 }
 0x14b   : > { %vm3859_vm5 = vcmp.eq.s32.totalorder %v5167_v57, 0  ;;  %v2313_v63 = vadd.f32 %v3868_v12, %v2275_v50  ;;  %v1480_v20 = vadd.f32 %v1448_v22, %v1412_v61  ;;  %v1583_v37 = vmul.f32 %v3523_v51, %v3642_v62 }
 0x14c   : > { %v1584_v36 = vmul.f32 %v3523_v51, %v3645_v34  ;;  %v3880_v14 = vadd.f32 %v3868_v12, %v2276_v33  ;;  %v1547_v19 = vadd.f32 %v1515_v6, %v1479_v52  ;;  %v1619_v1 = vmul.f32 %v3542_v3, %v3629_v42 }
 0x14d   : > { %v1620_v49 = vmul.f32 %v3542_v3, %v3635_v47  ;;  %v2377_v59 = vmul.f32 0.70710677, %v2313_v63  ;;  %v3887_v61 = vadd.f32 %v1516_v0, %v1480_v20  ;;  %v1687_v54 = vmul.f32 %v3558_v13, %v3667_v29 }
 0x14e   : > { %v3891_v50 = vmul.f32 0.5, %v2313_v63  ;;  %v2378_v57 = vmul.f32 0.70710677, %v3880_v14  ;;  %v5170_v22 = vand.u32 15, %v3545_v4  ;;  %v1651_v52 = vadd.f32 %v1619_v1, %v1583_v37 }
 0x14f   : > { %v1652_v6 = vadd.f32 %v1620_v49, %v1584_v36  ;;  %3190 = verf.f32 %v2377_v59  ;;  %v1688_v0 = vmul.f32 %v3558_v13, %v3669_v40  ;;  %v1756_v20 = vmul.f32 %v3526_v53, %v3645_v34 }
 0x150   : > { %vm3896_vm6 = vcmp.eq.s32.totalorder %v5170_v22, 15  ;;  %v1757_v63 = vmul.f32 %v3526_v53, %v3629_v42  ;;  %3192 = verf.f32 %v2378_v57  ;;  %v1719_v44 = vadd.f32 %v1687_v54, %v1651_v52 }
 0x151   : > { %v1792_v4 = vmul.f32 %v3563_v16, %v3635_v47  ;;  %v1793_v22 = vmul.f32 %v3563_v16, %v3667_v29  ;;  %v1720_v37 = vadd.f32 %v1688_v0, %v1652_v6  ;;  %v1860_v36 = vmul.f32 %v3790_v31, %v3669_v40 }
 0x152   : > { %v1861_v1 = vmul.f32 %v3790_v31, %v3662_v60  ;;  %v1923_v49 = vrot.slane %v1547_v19, 7  ;;  %v5136_v43 = vrot.slane %v3887_v61, 7  ;;  %v1413_v54 = vmul.f32 %v3517_v48, %v3629_v42 }
 0x153   : > { %v1824_v59 = vadd.f32 %v1792_v4, %v1756_v20  ;;  %v1825_v10 = vadd.f32 %v1793_v22, %v1757_v63  ;;  %v1414_v52 = vmul.f32 %v3517_v48, %v3635_v47  ;;  %v1449_v6 = vmul.f32 %v3529_v55, %v3667_v29 }
 0x154   : > { %v1975_v57 = vsel %vm1949_vm2, %v1922_v30, %v1923_v49  ;;  %v1450_v19 = vmul.f32 %v3529_v55, %v3669_v40  ;;  %v1974_v8 = vsel %vm1949_vm2, %v1923_v49, %v5136_v43  ;;  %v1586_v17 = vmul.f32 %v3523_v51, %v3635_v47 }
 0x155   : > { %v1892_v0 = vadd.f32 %v1860_v36, %v1824_v59  ;;  %v3927_v20 = vadd.f32 %v1861_v1, %v1825_v10  ;;  %v2052_v30 = vsel %vm3859_vm5, 0.0, %v1975_v57  ;;  %v2246_v4 = vadd.f32 %v1974_v8, %v1720_v37 }
 0x156   : > { %v2245_v63 = vadd.f32 %v2052_v30, %v1719_v44  ;;  %v1481_v22 = vadd.f32 %v1449_v6, %v1413_v54  ;;  %v1482_v28 = vadd.f32 %v1450_v19, %v1414_v52  ;;  %v1517_v36 = vmul.f32 %v3532_v58, %v3662_v60 }
 0x157   : > { %v2085_v39 = vrot.slane %v1892_v0, 1  ;;  %v5135_v38 = vrot.slane %v3927_v20, 1  ;;  %v1518_v10 = vmul.f32 %v3532_v58, %v3664_v21  ;;  %v1585_v1 = vmul.f32 %v3523_v51, %v3629_v42 }
 0x158   : > { %v1621_v44 = vmul.f32 %v3542_v3, %v3667_v29  ;;  %v1622_v37 = vmul.f32 %v3542_v3, %v3669_v40  ;;  %v5173_v59 = vrot.slane %v3808_v25, 1  ;;  %v5174_v42 = vand.u32 15, %v3548_v5 }
 0x159   : > { %v2134_v49 = vsel %vm2110_vm4, %v2085_v39, %v5135_v38  ;;  %v1549_v52 = vadd.f32 %v1517_v36, %v1481_v22  ;;  %v3962_v6 = vadd.f32 %v1518_v10, %v1482_v28  ;;  %v3191_v19 = vpop.eup %3190  ;;  %v1689_v5 = vmul.f32 %v3558_v13, %v3662_v60  ;;  %v5177_v10 = vld [vmem:[#allocation7_spill] sm:$0xff] }
 0x15a   : > { %v2135_v54 = vsel %vm2110_vm4, %v5173_v59, %v2085_v39  ;;  %vm3958_vm7 = vcmp.eq.s32.totalorder %v5174_v42, 0  ;;  %v2214_v0 = vsel %vm3896_vm6, 0.0, %v2134_v49  ;;  %v1653_v30 = vadd.f32 %v1621_v44, %v1585_v1  ;;  %v3193_v25 = vpop.eup %3192 }
 0x15b   : > { %v2277_v8 = vadd.f32 %v2245_v63, %v2135_v54  ;;  %v1654_v38 = vadd.f32 %v1622_v37, %v1586_v17  ;;  %v2441_v43 = vadd.f32 1.0, %v3191_v19  ;;  %v2278_v34 = vadd.f32 %v2246_v4, %v2214_v0 }
 0x15c   : > { %v1690_v39 = vmul.f32 %v3558_v13, %v3664_v21  ;;  %v2346_v22 = vmul.f32 0.5, %v3880_v14  ;;  %v2442_v28 = vadd.f32 1.0, %v3193_v25  ;;  %v1758_v33 = vmul.f32 %v3526_v53, %v3635_v47 }
 0x15d   : > { %v2315_v36 = vadd.f32 %v3868_v12, %v2277_v8  ;;  %v2316_v63 = vadd.f32 %v3868_v12, %v2278_v34  ;;  %v5178_v1 = vand.u32 15, %v5177_v10  ;;  %v1721_v17 = vadd.f32 %v1689_v5, %v1653_v30 }
 0x15e   : > { %v1722_v44 = vadd.f32 %v1690_v39, %v1654_v38  ;;  %v1759_v37 = vmul.f32 %v3526_v53, %v3667_v29  ;;  %v2473_v14 = vmul.f32 %v2441_v43, %v3891_v50  ;;  %v2474_v49 = vmul.f32 %v2442_v28, %v2346_v22 }
 0x15f   : > { %vm3977_vm8 = vcmp.eq.s32.totalorder %v5178_v1, 15  ;;  %v2379_v59 = vmul.f32 0.70710677, %v2315_v36  ;;  %v1794_v47 = vmul.f32 %v3563_v16, %v3669_v40  ;;  %v2347_v54 = vmul.f32 0.5, %v2315_v36 }
 0x160   : > { %v2380_v34 = vmul.f32 0.70710677, %v2316_v63  ;;  %v1795_v42 = vmul.f32 %v3563_v16, %v3662_v60  ;;  %v1862_v19 = vmul.f32 %v3790_v31, %v3664_v21  ;;  %v2503_v0 = vpack.c.bf16 %v2474_v49, %v2473_v14 }
 0x161   : > { %3194 = verf.f32 %v2379_v59  ;;  %v1826_v38 = vadd.f32 %v1794_v47, %v1758_v33  ;;  %v1863_v8 = vmul.f32 %v3790_v31, %v3703_v7  ;;  %v1925_v50 = vrot.slane %v1549_v52, 7 }
 0x162   : > { %3196 = verf.f32 %v2380_v34  ;;  %v1827_v43 = vadd.f32 %v1795_v42, %v1759_v37  ;;  %v1926_v30 = vrot.slane %v3962_v6, 7  ;;  %3014 = vmatprep.mubr.bf16.mxu1 %v2503_v0  ;;  %v1415_v5 = vmul.f32 %v3517_v48, %v3667_v29  ;;  %v5183_v0 = vld [vmem:[#allocation21_spill] sm:$0xff] }
 0x163   : > { %v1894_v25 = vadd.f32 %v1862_v19, %v1826_v38  ;;  %v1416_v39 = vmul.f32 %v3517_v48, %v3669_v40  ;;  %v1451_v22 = vmul.f32 %v3529_v55, %v3662_v60  ;;  %v5181_v36 = vrot.slane %v3887_v61, 7 }
 0x164   : > { %v3999_v28 = vadd.f32 %v1863_v8, %v1827_v43  ;;  %v1972_v52 = vsel %vm1949_vm2, %v1925_v50, %v1926_v30  ;;  %v1452_v10 = vmul.f32 %v3529_v55, %v3664_v21  ;;  %v1519_v42 = vmul.f32 %v3532_v58, %v3703_v7  ;;  %v5184_v43 = vld [vmem:[#allocation8_spill] sm:$0xff] }
 0x165   : > { %v1973_v33 = vsel %vm1949_vm2, %v5181_v36, %v1925_v50  ;;  %v2087_v37 = vrot.slane %v1894_v25, 1  ;;  %v2248_v14 = vadd.f32 %v1972_v52, %v1722_v44  ;;  %v1483_v49 = vadd.f32 %v1451_v22, %v1415_v5  ;;  %v5193_v50 = vld [vmem:[#allocation20_spill] sm:$0xff] }
 0x166   : > { %v2054_v1 = vsel %vm3958_vm7, 0.0, %v1973_v33  ;;  %v2088_v59 = vrot.slane %v3999_v28, 1  ;;  %v1484_v34 = vadd.f32 %v1452_v10, %v1416_v39  ;;  %v5182_v61 = vrot.slane %v3927_v20, 1 }
 0x167   : > { %v2247_v47 = vadd.f32 %v2054_v1, %v1721_v17  ;;  %v1520_v38 = vmul.f32 %v3532_v58, %v5183_v0  ;;  %v1587_v57 = vmul.f32 %v3523_v51, %v3667_v29  ;;  %v1588_v44 = vmul.f32 %v3523_v51, %v3669_v40 }
 0x168   : > { %v2133_v19 = vsel %vm2110_vm4, %v5182_v61, %v2087_v37  ;;  %v2132_v17 = vsel %vm2110_vm4, %v2087_v37, %v2088_v59  ;;  %v5185_v20 = vand.u32 15, %v5184_v43  ;;  %v1551_v25 = vadd.f32 %v1519_v42, %v1483_v49 }
 0x169   : > { %v2279_v8 = vadd.f32 %v2247_v47, %v2133_v19  ;;  %v1623_v5 = vmul.f32 %v3542_v3, %v3662_v60  ;;  %v2216_v29 = vsel %vm3977_vm8, 0.0, %v2132_v17  ;;  %v4040_v39 = vadd.f32 %v1520_v38, %v1484_v34  ;;  %v5188_v38 = vld [vmem:[#allocation9_spill] sm:$0xff] }
 0x16a   : > { %vm4032_vm9 = vcmp.eq.s32.totalorder %v5185_v20, 0  ;;  %v1624_v22 = vmul.f32 %v3542_v3, %v3664_v21  ;;  %v1691_v52 = vmul.f32 %v3558_v13, %v3703_v7  ;;  %v2280_v36 = vadd.f32 %v2248_v14, %v2216_v29 }
 0x16b   : > { %v2317_v33 = vadd.f32 %v3868_v12, %v2279_v8  ;;  %v1655_v10 = vadd.f32 %v1623_v5, %v1587_v57  ;;  %v1692_v1 = vmul.f32 %v3558_v13, %v5183_v0  ;;  %v3195_v37 = vpop.eup %3194  ;;  %v2348_v49 = vmul.f32 0.5, %v2316_v63 }
 0x16c   : > { %v1656_v47 = vadd.f32 %v1624_v22, %v1588_v44  ;;  %v1760_v4 = vmul.f32 %v3526_v53, %v3669_v40  ;;  %v1796_v34 = vmul.f32 %v3563_v16, %v3664_v21  ;;  %v3197_v42 = vpop.eup %3196  ;;  %v2443_v61 = vadd.f32 1.0, %v3195_v37 }
 0x16d   : > { %v2318_v19 = vadd.f32 %v3868_v12, %v2280_v36  ;;  %v2381_v14 = vmul.f32 0.70710677, %v2317_v33  ;;  %v5189_v17 = vand.u32 15, %v5188_v38  ;;  %v1761_v63 = vmul.f32 %v3526_v53, %v3662_v60 }
 0x16e   : > { %v2444_v44 = vadd.f32 1.0, %v3197_v42  ;;  %v1723_v8 = vadd.f32 %v1691_v52, %v1655_v10  ;;  %v1724_v40 = vadd.f32 %v1692_v1, %v1656_v47  ;;  %v1797_v43 = vmul.f32 %v3563_v16, %v3703_v7 }
 0x16f   : > { %vm4056_vm10 = vcmp.eq.s32.totalorder %v5189_v17, 15  ;;  %v4065_v20 = vunpack.c.l.bf16 %v3806_v9  ;;  %v2475_v5 = vmul.f32 %v2443_v61, %v2347_v54  ;;  %v2382_v29 = vmul.f32 0.70710677, %v2318_v19  ;;  %v5192_v17 = vld [vmem:[#allocation19_spill] sm:$0xff] }
 0x170   : > { %3198 = verf.f32 %v2381_v14  ;;  %v2476_v22 = vmul.f32 %v2444_v44, %v2348_v49  ;;  %v1828_v36 = vadd.f32 %v1796_v34, %v1760_v4  ;;  %v1829_v37 = vadd.f32 %v1797_v43, %v1761_v63 }
 0x171   : > { %v1864_v38 = vmul.f32 %v3790_v31, %v5183_v0  ;;  %3200 = verf.f32 %v2382_v29  ;;  %v1865_v52 = vmul.f32 %v3790_v31, %v5192_v17  ;;  %v1927_v10 = vrot.slane %v1551_v25, 7 }
 0x172   : > { %v1928_v1 = vrot.slane %v4040_v39, 7  ;;  %v2504_v47 = vpack.c.bf16 %v2476_v22, %v2475_v5  ;;  %v1417_v54 = vmul.f32 %v3517_v48, %v3662_v60  ;;  %v1418_v49 = vmul.f32 %v3517_v48, %v3664_v21 }
 0x173   : > { %v1896_v42 = vadd.f32 %v1864_v38, %v1828_v36  ;;  %v4076_v4 = vadd.f32 %v1865_v52, %v1829_v37  ;;  %v1971_v25 = vsel %vm1949_vm2, %v1926_v30, %v1927_v10  ;;  %v1453_v61 = vmul.f32 %v3529_v55, %v3703_v7  ;;  %v5194_v52 = vld [vmem:[#allocation10_spill] sm:$0xff] }
 0x174   : > { %v1970_v34 = vsel %vm1949_vm2, %v1927_v10, %v1928_v1  ;;  %3015 = vmatmul.mubr.bf16.vlgmr.msra.gmra.mrb[0].mxu1 %v2504_v47  ;;  %v2056_v14 = vsel %vm4032_vm9, 0.0, %v1971_v25  ;;  %v1454_v43 = vmul.f32 %v3529_v55, %v5183_v0  ;;  %v1521_v6 = vmul.f32 %v3532_v58, %v5192_v17 }
 0x175   : > { %v2089_v63 = vrot.slane %v1896_v42, 1  ;;  %v2250_v44 = vadd.f32 %v1970_v34, %v1724_v40  ;;  %v2090_v5 = vrot.slane %v4076_v4, 1  ;;  %v2249_v29 = vadd.f32 %v2056_v14, %v1723_v8 }
 0x176   : > { %v1485_v22 = vadd.f32 %v1453_v61, %v1417_v54  ;;  %v1486_v36 = vadd.f32 %v1454_v43, %v1418_v49  ;;  %v1522_v37 = vmul.f32 %v3532_v58, %v5193_v50  ;;  %v1589_v40 = vmul.f32 %v3523_v51, %v3662_v60 }
 0x177   : > { %v2131_v30 = vsel %vm2110_vm4, %v2088_v59, %v2089_v63  ;;  %v2130_v8 = vsel %vm2110_vm4, %v2089_v63, %v2090_v5  ;;  %v5195_v10 = vand.u32 15, %v5194_v52  ;;  %v1590_v47 = vmul.f32 %v3523_v51, %v3664_v21 }
 0x178   : > { %v2281_v38 = vadd.f32 %v2249_v29, %v2131_v30  ;;  %v1553_v59 = vadd.f32 %v1521_v6, %v1485_v22  ;;  %v2218_v42 = vsel %vm4056_vm10, 0.0, %v2130_v8  ;;  %v4117_v60 = vadd.f32 %v1522_v37, %v1486_v36  ;;  %v5198_v8 = vld [vmem:[#allocation11_spill] sm:$0xff] }
 0x179   : > { %vm4109_vm11 = vcmp.eq.s32.totalorder %v5195_v10, 0  ;;  %v1625_v54 = vmul.f32 %v3542_v3, %v3703_v7  ;;  %v1626_v49 = vmul.f32 %v3542_v3, %v5183_v0  ;;  %v2349_v25 = vmul.f32 0.5, %v2317_v33 }
 0x17a   : > { %v3199_v34 = vpop.eup %3198  ;;  %v2282_v61 = vadd.f32 %v2250_v44, %v2218_v42  ;;  %v2319_v14 = vadd.f32 %v3868_v12, %v2281_v38  ;;  %v1693_v63 = vmul.f32 %v3558_v13, %v5192_v17  ;;  %v1694_v22 = vmul.f32 %v3558_v13, %v5193_v50 }
 0x17b   : > { %v2445_v43 = vadd.f32 1.0, %v3199_v34  ;;  %v1657_v29 = vadd.f32 %v1625_v54, %v1589_v40  ;;  %v1658_v57 = vadd.f32 %v1626_v49, %v1590_v47  ;;  %v3201_v6 = vpop.eup %3200  ;;  %v2350_v30 = vmul.f32 0.5, %v2318_v19 }
 0x17c   : > { %v2320_v36 = vadd.f32 %v3868_v12, %v2282_v61  ;;  %v2383_v37 = vmul.f32 0.70710677, %v2319_v14  ;;  %v1762_v33 = vmul.f32 %v3526_v53, %v3664_v21  ;;  %v2446_v44 = vadd.f32 1.0, %v3201_v6 }
 0x17d   : > { %v5199_v38 = vand.u32 15, %v5198_v8  ;;  %v1725_v40 = vadd.f32 %v1693_v63, %v1657_v29  ;;  %v1726_v10 = vadd.f32 %v1694_v22, %v1658_v57  ;;  %v1763_v47 = vmul.f32 %v3526_v53, %v3703_v7 }
 0x17e   : > { %v2477_v42 = vmul.f32 %v2445_v43, %v2349_v25  ;;  %v2384_v19 = vmul.f32 0.70710677, %v2320_v36  ;;  %3202 = verf.f32 %v2383_v37  ;;  %v1798_v54 = vmul.f32 %v3563_v16, %v5183_v0 }
 0x17f   : > { %vm4133_vm12 = vcmp.eq.s32.totalorder %v5199_v38, 15  ;;  %v2478_v49 = vmul.f32 %v2446_v44, %v2350_v30  ;;  %v1799_v21 = vmul.f32 %v3563_v16, %v5192_v17  ;;  %v1866_v34 = vmul.f32 %v3790_v31, %v5193_v50 }
 0x180   : > { %v1867_v61 = vmul.f32 %v3790_v31, %v3719_v2  ;;  %3204 = verf.f32 %v2384_v19  ;;  %v1830_v63 = vadd.f32 %v1798_v54, %v1762_v33  ;;  %v1929_v29 = vrot.slane %v1553_v59, 7 }
 0x181   : > { %v1930_v25 = vrot.slane %v4117_v60, 7  ;;  %v4149_v43 = vunpack.c.h.bf16 %v3806_v9  ;;  %v2505_v57 = vpack.c.bf16 %v2478_v49, %v2477_v42  ;;  %v2351_v22 = vmul.f32 0.5, %v2319_v14 }
 0x182   : > { %v1831_v6 = vadd.f32 %v1799_v21, %v1763_v47  ;;  %v1898_v30 = vadd.f32 %v1866_v34, %v1830_v63  ;;  %v1969_v33 = vsel %vm1949_vm2, %v1928_v1, %v1929_v29  ;;  %v300_v59 = vadd.s32 112, %v3481_v27 }
 0x183   : > { %v1968_v37 = vsel %vm1949_vm2, %v1929_v29, %v1930_v25  ;;  %3018 = vmatprep.mubr.bf16.mxu1 %v2505_v57  ;;  %v2058_v9 = vsel %vm4109_vm11, 0.0, %v1969_v33  ;;  %v1419_v8 = vmul.f32 %v3517_v48, %v3703_v7  ;;  %v2352_v38 = vmul.f32 0.5, %v2320_v36 }
 0x184   : > { %v4160_v44 = vadd.f32 %v1867_v61, %v1831_v6  ;;  %v2252_v14 = vadd.f32 %v1968_v37, %v1726_v10  ;;  %v2091_v47 = vrot.slane %v1898_v30, 1  ;;  %v2251_v42 = vadd.f32 %v2058_v9, %v1725_v40 }
 0x185   : > { %v1420_v39 = vmul.f32 %v3517_v48, %v5183_v0  ;;  %v301_v19 = vadd.s32 120, %v3481_v27  ;;  %v1455_v54 = vmul.f32 %v3529_v55, %v5192_v17  ;;  %v1456_v28 = vmul.f32 %v3529_v55, %v5193_v50 }
 0x186   : > { %v2092_v1 = vrot.slane %v4160_v44, 1  ;;  %v2129_v36 = vsel %vm2110_vm4, %v2090_v5, %v2091_v47  ;;  %v420_v10 = vand.u32 15, %v300_v59  ;;  %v1523_v40 = vmul.f32 %v3532_v58, %v3719_v2 }
 0x187   : > { %v1524_v49 = vmul.f32 %v3532_v58, %v3721_v11  ;;  %v2283_v34 = vadd.f32 %v2251_v42, %v2129_v36  ;;  %v1487_v61 = vadd.f32 %v1455_v54, %v1419_v8  ;;  %v1488_v63 = vadd.f32 %v1456_v28, %v1420_v39 }
 0x188   : > { %v2128_v21 = vsel %vm2110_vm4, %v2091_v47, %v2092_v1  ;;  %v3203_v29 = vpop.eup %3202  ;;  %v1591_v5 = vmul.f32 %v3523_v51, %v3703_v7  ;;  %v1592_v57 = vmul.f32 %v3523_v51, %v5183_v0  ;;  %v1627_v6 = vmul.f32 %v3542_v3, %v5192_v17 }
 0x189   : > { %v2220_v4 = vsel %vm4133_vm12, 0.0, %v2128_v21  ;;  %v2447_v30 = vadd.f32 1.0, %v3203_v29  ;;  %v2321_v33 = vadd.f32 %v3868_v12, %v2283_v34  ;;  %v1555_v59 = vadd.f32 %v1523_v40, %v1487_v61 }
 0x18a   : > { %v2284_v37 = vadd.f32 %v2252_v14, %v2220_v4  ;;  %v3205_v9 = vpop.eup %3204  ;;  %v4195_v8 = vadd.f32 %v1524_v49, %v1488_v63  ;;  %v1628_v52 = vmul.f32 %v3542_v3, %v5193_v50  ;;  %v1659_v47 = vadd.f32 %v1627_v6, %v1591_v5 }
 0x18b   : > { %v1695_v7 = vmul.f32 %v3558_v13, %v3719_v2  ;;  %v2448_v42 = vadd.f32 1.0, %v3205_v9  ;;  %v2479_v39 = vmul.f32 %v2447_v30, %v2351_v22  ;;  %v427_v28 = vand.u32 15, %v301_v19 }
 0x18c   : > { %v2322_v54 = vadd.f32 %v3868_v12, %v2284_v37  ;;  %v2385_v36 = vmul.f32 0.70710677, %v2321_v33  ;;  %v1660_v14 = vadd.f32 %v1628_v52, %v1592_v57  ;;  %v1696_v40 = vmul.f32 %v3558_v13, %v3721_v11 }
 0x18d   : > { %v1727_v21 = vadd.f32 %v1695_v7, %v1659_v47  ;;  %v2480_v49 = vmul.f32 %v2448_v42, %v2352_v38  ;;  %vm4204_vm13 = vcmp.eq.s32.totalorder %v420_v10, 0  ;;  %v1764_v63 = vmul.f32 %v3526_v53, %v5183_v0 }
 0x18e   : > { %v2386_v34 = vmul.f32 0.70710677, %v2322_v54  ;;  %3206 = verf.f32 %v2385_v36  ;;  %v1728_v22 = vadd.f32 %v1696_v40, %v1660_v14  ;;  %v1765_v19 = vmul.f32 %v3526_v53, %v5192_v17 }
 0x18f   : > { %v1800_v29 = vmul.f32 %v3563_v16, %v5193_v50  ;;  %v2506_v4 = vpack.c.bf16 %v2480_v49, %v2479_v39  ;;  %v1801_v38 = vmul.f32 %v3563_v16, %v3719_v2  ;;  %v1868_v10 = vmul.f32 %v3790_v31, %v3721_v11 }
 0x190   : > { %3208 = verf.f32 %v2386_v34  ;;  %vm4218_vm14 = vcmp.eq.s32.totalorder %v427_v28, 15  ;;  %v1931_v57 = vrot.slane %v1555_v59, 7  ;;  %v1932_v6 = vrot.slane %v4195_v8, 7 }
 0x191   : > { %v1832_v0 = vadd.f32 %v1800_v29, %v1764_v63  ;;  %3019 = vmatmul.mubr.bf16.gmra.mrb[4].mxu1 %v2506_v4  ;;  %v2353_v30 = vmul.f32 0.5, %v2321_v33  ;;  %v1833_v37 = vadd.f32 %v1801_v38, %v1765_v19  ;;  %v1869_v9 = vmul.f32 %v3790_v31, %v3714_v46 }
 0x192   : > { %v302_v52 = vadd.s32 128, %v3481_v27  ;;  %v2354_v47 = vmul.f32 0.5, %v2322_v54  ;;  %v1966_v42 = vsel %vm1949_vm2, %v1931_v57, %v1932_v6  ;;  %v1967_v59 = vsel %vm1949_vm2, %v1930_v25, %v1931_v57 }
 0x193   : > { %v1900_v7 = vadd.f32 %v1868_v10, %v1832_v0  ;;  %v4234_v39 = vadd.f32 %v1869_v9, %v1833_v37  ;;  %v2060_v33 = vsel %vm4204_vm13, 0.0, %v1967_v59  ;;  %v2254_v28 = vadd.f32 %v1966_v42, %v1728_v22 }
 0x194   : > { %v303_v36 = vadd.s32 136, %v3481_v27  ;;  %v2253_v14 = vadd.f32 %v2060_v33, %v1727_v21  ;;  %v1421_v40 = vmul.f32 %v3517_v48, %v5192_v17  ;;  %v1457_v49 = vmul.f32 %v3529_v55, %v3719_v2 }
 0x195   : > { %v2093_v54 = vrot.slane %v1900_v7, 1  ;;  %v2094_v60 = vrot.slane %v4234_v39, 1  ;;  %v434_v34 = vand.u32 15, %v302_v52  ;;  %v1422_v25 = vmul.f32 %v3517_v48, %v5193_v50 }
 0x196   : > { %v1458_v61 = vmul.f32 %v3529_v55, %v3721_v11  ;;  %v1489_v63 = vadd.f32 %v1457_v49, %v1421_v40  ;;  %v1525_v22 = vmul.f32 %v3532_v58, %v3714_v46  ;;  %v1526_v19 = vmul.f32 %v3532_v58, %v3717_v15 }
 0x197   : > { %v2127_v21 = vsel %vm2110_vm4, %v2092_v1, %v2093_v54  ;;  %v2126_v29 = vsel %vm2110_vm4, %v2093_v54, %v2094_v60  ;;  %v1593_v44 = vmul.f32 %v3523_v51, %v5192_v17  ;;  %v1594_v57 = vmul.f32 %v3523_v51, %v5193_v50 }
 0x198   : > { %v2285_v4 = vadd.f32 %v2253_v14, %v2127_v21  ;;  %v1490_v38 = vadd.f32 %v1458_v61, %v1422_v25  ;;  %v3207_v10 = vpop.eup %3206  ;;  %v2222_v1 = vsel %vm4218_vm14, 0.0, %v2126_v29  ;;  %v1557_v0 = vadd.f32 %v1525_v22, %v1489_v63 }
 0x199   : > { %v1629_v37 = vmul.f32 %v3542_v3, %v3719_v2  ;;  %v2449_v52 = vadd.f32 1.0, %v3207_v10  ;;  %v2286_v7 = vadd.f32 %v2254_v28, %v2222_v1  ;;  %v1630_v17 = vmul.f32 %v3542_v3, %v3721_v11 }
 0x19a   : > { %v3209_v9 = vpop.eup %3208  ;;  %v2323_v42 = vadd.f32 %v3868_v12, %v2285_v4  ;;  %v4269_v59 = vadd.f32 %v1526_v19, %v1490_v38  ;;  %v1697_v54 = vmul.f32 %v3558_v13, %v3714_v46  ;;  %v441_v25 = vand.u32 15, %v303_v36 }
 0x19b   : > { %v2450_v33 = vadd.f32 1.0, %v3209_v9  ;;  %v1661_v5 = vadd.f32 %v1629_v37, %v1593_v44  ;;  %v2481_v14 = vmul.f32 %v2449_v52, %v2353_v30  ;;  %v2324_v40 = vadd.f32 %v3868_v12, %v2286_v7 }
 0x19c   : > { %v2387_v49 = vmul.f32 0.70710677, %v2323_v42  ;;  %v1662_v21 = vadd.f32 %v1630_v17, %v1594_v57  ;;  %v1698_v28 = vmul.f32 %v3558_v13, %v3717_v15  ;;  %vm4278_vm15 = vcmp.eq.s32.totalorder %v434_v34, 0 }
 0x19d   : > { %v2482_v61 = vmul.f32 %v2450_v33, %v2354_v47  ;;  %v1729_v63 = vadd.f32 %v1697_v54, %v1661_v5  ;;  %v2388_v22 = vmul.f32 0.70710677, %v2324_v40  ;;  %v1766_v29 = vmul.f32 %v3526_v53, %v5193_v50 }
 0x19e   : > { %3210 = verf.f32 %v2387_v49  ;;  %v1730_v4 = vadd.f32 %v1698_v28, %v1662_v21  ;;  %v1767_v36 = vmul.f32 %v3526_v53, %v3719_v2  ;;  %v1802_v47 = vmul.f32 %v3563_v16, %v3721_v11 }
 0x19f   : > { %v2507_v30 = vpack.c.bf16 %v2482_v61, %v2481_v14  ;;  %3212 = verf.f32 %v2388_v22  ;;  %vm4288_vm0 = vcmp.eq.s32.totalorder %v441_v25, 15  ;;  %v1803_v34 = vmul.f32 %v3563_v16, %v3714_v46 }
 0x1a0   : > { %v1871_v44 = vmul.f32 %v3790_v31, %v3731_v35  ;;  %v1834_v50 = vadd.f32 %v1802_v47, %v1766_v29  ;;  %v1870_v10 = vmul.f32 %v3790_v31, %v3717_v15  ;;  %v1933_v1 = vrot.slane %v1557_v0, 7  ;;  %v5210_v29 = vld [vmem:[#allocation24_spill] sm:$0xff] }
 0x1a1   : > { %3022 = vmatprep.mubr.bf16.mxu1 %v2507_v30  ;;  %v1934_v57 = vrot.slane %v4269_v59, 7  ;;  %v2355_v37 = vmul.f32 0.5, %v2323_v42  ;;  %v2356_v9 = vmul.f32 0.5, %v2324_v40  ;;  %v1835_v52 = vadd.f32 %v1803_v34, %v1767_v36 }
 0x1a2   : > { %v304_v7 = vadd.s32 144, %v3481_v27  ;;  %v1902_v33 = vadd.f32 %v1870_v10, %v1834_v50  ;;  %v1965_v5 = vsel %vm1949_vm2, %v1932_v6, %v1933_v1  ;;  %v1423_v0 = vmul.f32 %v3517_v48, %v3719_v2 }
 0x1a3   : > { %v1964_v17 = vsel %vm1949_vm2, %v1933_v1, %v1934_v57  ;;  %v4310_v54 = vadd.f32 %v1871_v44, %v1835_v52  ;;  %v2062_v42 = vsel %vm4278_vm15, 0.0, %v1965_v5  ;;  %v1424_v40 = vmul.f32 %v3517_v48, %v3721_v11 }
 0x1a4   : > { %v2256_v14 = vadd.f32 %v1964_v17, %v1730_v4  ;;  %v2095_v49 = vrot.slane %v1902_v33, 1  ;;  %v2255_v25 = vadd.f32 %v2062_v42, %v1729_v63  ;;  %v305_v61 = vadd.s32 152, %v3481_v27 }
 0x1a5   : > { %v1459_v8 = vmul.f32 %v3529_v55, %v3714_v46  ;;  %v2096_v6 = vrot.slane %v4310_v54, 1  ;;  %v448_v21 = vand.u32 15, %v304_v7  ;;  %v1460_v28 = vmul.f32 %v3529_v55, %v3717_v15 }
 0x1a6   : > { %v1527_v22 = vmul.f32 %v3532_v58, %v3731_v35  ;;  %v2125_v19 = vsel %vm2110_vm4, %v2094_v60, %v2095_v49  ;;  %v1528_v30 = vmul.f32 %v3532_v58, %v5210_v29  ;;  %v1595_v4 = vmul.f32 %v3523_v51, %v3719_v2 }
 0x1a7   : > { %v1491_v63 = vadd.f32 %v1459_v8, %v1423_v0  ;;  %v2124_v47 = vsel %vm2110_vm4, %v2095_v49, %v2096_v6  ;;  %v2287_v34 = vadd.f32 %v2255_v25, %v2125_v19  ;;  %v1492_v44 = vadd.f32 %v1460_v28, %v1424_v40 }
 0x1a8   : > { %v3211_v36 = vpop.eup %3210  ;;  %v1596_v39 = vmul.f32 %v3523_v51, %v3721_v11  ;;  %v2224_v60 = vsel %vm4288_vm0, 0.0, %v2124_v47  ;;  %v1631_v1 = vmul.f32 %v3542_v3, %v3714_v46  ;;  %v1632_v17 = vmul.f32 %v3542_v3, %v3717_v15 }
 0x1a9   : > { %v2451_v50 = vadd.f32 1.0, %v3211_v36  ;;  %v1559_v10 = vadd.f32 %v1527_v22, %v1491_v63  ;;  %v3213_v2 = vpop.eup %3212  ;;  %v2288_v52 = vadd.f32 %v2256_v14, %v2224_v60  ;;  %v2325_v7 = vadd.f32 %v3868_v12, %v2287_v34 }
 0x1aa   : > { %v4343_v33 = vadd.f32 %v1528_v30, %v1492_v44  ;;  %v2452_v5 = vadd.f32 1.0, %v3213_v2  ;;  %v1663_v42 = vadd.f32 %v1631_v1, %v1595_v4  ;;  %v1699_v38 = vmul.f32 %v3558_v13, %v3731_v35 }
 0x1ab   : > { %v2483_v0 = vmul.f32 %v2451_v50, %v2355_v37  ;;  %v2326_v40 = vadd.f32 %v3868_v12, %v2288_v52  ;;  %v2389_v49 = vmul.f32 0.70710677, %v2325_v7  ;;  %v455_v25 = vand.u32 15, %v305_v61 }
 0x1ac   : > { %v1664_v8 = vadd.f32 %v1632_v17, %v1596_v39  ;;  %v2484_v28 = vmul.f32 %v2452_v5, %v2356_v9  ;;  %v1700_v14 = vmul.f32 %v3558_v13, %v5210_v29  ;;  %v1731_v22 = vadd.f32 %v1699_v38, %v1663_v42  ;;  %v5215_v39 = vld [vmem:[#allocation22_spill] sm:$0xff] }
 0x1ad   : > { %v1768_v19 = vmul.f32 %v3526_v53, %v3721_v11  ;;  %v2390_v63 = vmul.f32 0.70710677, %v2326_v40  ;;  %3214 = verf.f32 %v2389_v49  ;;  %vm4354_vm1 = vcmp.eq.s32.totalorder %v448_v21, 0 }
 0x1ae   : > { %v1769_v30 = vmul.f32 %v3526_v53, %v3714_v46  ;;  %v2508_v4 = vpack.c.bf16 %v2484_v28, %v2483_v0  ;;  %v1732_v61 = vadd.f32 %v1700_v14, %v1664_v8  ;;  %v1804_v9 = vmul.f32 %v3563_v16, %v3717_v15 }
 0x1af   : > { %v1805_v36 = vmul.f32 %v3563_v16, %v3731_v35  ;;  %3216 = verf.f32 %v2390_v63  ;;  %vm4364_vm3 = vcmp.eq.s32.totalorder %v455_v25, 15  ;;  %v1872_v21 = vmul.f32 %v3790_v31, %v5210_v29 }
 0x1b0   : > { %v1935_v47 = vrot.slane %v1559_v10, 7  ;;  %3023 = vmatmul.mubr.bf16.gmra.mrb[8].mxu1 %v2508_v4  ;;  %v1836_v34 = vadd.f32 %v1804_v9, %v1768_v19  ;;  %v1873_v50 = vmul.f32 %v3790_v31, %v5215_v39  ;;  %v1936_v60 = vrot.slane %v4343_v33, 7  ;;  %v5216_v19 = vld [vmem:[#allocation23_spill] sm:$0xff] }
 0x1b1   : > { %v1837_v44 = vadd.f32 %v1805_v36, %v1769_v30  ;;  %v2357_v1 = vmul.f32 0.5, %v2325_v7  ;;  %v306_v52 = vadd.s32 160, %v3481_v27  ;;  %v307_v17 = vadd.s32 168, %v3481_v27 }
 0x1b2   : > { %v1963_v2 = vsel %vm1949_vm2, %v1934_v57, %v1935_v47  ;;  %v1904_v5 = vadd.f32 %v1872_v21, %v1836_v34  ;;  %v1962_v31 = vsel %vm1949_vm2, %v1935_v47, %v1936_v60  ;;  %v1425_v57 = vmul.f32 %v3517_v48, %v3714_v46 }
 0x1b3   : > { %v4379_v10 = vadd.f32 %v1873_v50, %v1837_v44  ;;  %v2064_v7 = vsel %vm4354_vm1, 0.0, %v1963_v2  ;;  %v2258_v59 = vadd.f32 %v1962_v31, %v1732_v61  ;;  %v1426_v42 = vmul.f32 %v3517_v48, %v3717_v15 }
 0x1b4   : > { %v2257_v0 = vadd.f32 %v2064_v7, %v1731_v22  ;;  %v2097_v38 = vrot.slane %v1904_v5, 1  ;;  %v1461_v25 = vmul.f32 %v3529_v55, %v3731_v35  ;;  %v1462_v8 = vmul.f32 %v3529_v55, %v5210_v29 }
 0x1b5   : > { %v2098_v49 = vrot.slane %v4379_v10, 1  ;;  %v2358_v28 = vmul.f32 0.5, %v2326_v40  ;;  %v462_v14 = vand.u32 15, %v306_v52  ;;  %v1529_v22 = vmul.f32 %v3532_v58, %v5215_v39 }
 0x1b6   : > { %v1530_v63 = vmul.f32 %v3532_v58, %v5216_v19  ;;  %v2123_v30 = vsel %vm2110_vm4, %v2096_v6, %v2097_v38  ;;  %v1493_v4 = vadd.f32 %v1461_v25, %v1425_v57  ;;  %v1494_v61 = vadd.f32 %v1462_v8, %v1426_v42 }
 0x1b7   : > { %v2122_v37 = vsel %vm2110_vm4, %v2097_v38, %v2098_v49  ;;  %v3215_v40 = vpop.eup %3214  ;;  %v2289_v36 = vadd.f32 %v2257_v0, %v2123_v30  ;;  %v469_v21 = vand.u32 15, %v307_v17  ;;  %v1597_v47 = vmul.f32 %v3523_v51, %v3714_v46 }
 0x1b8   : > { %v2226_v9 = vsel %vm4364_vm3, 0.0, %v2122_v37  ;;  %v2453_v34 = vadd.f32 1.0, %v3215_v40  ;;  %v1561_v50 = vadd.f32 %v1529_v22, %v1493_v4  ;;  %v4412_v2 = vadd.f32 %v1530_v63, %v1494_v61 }
 0x1b9   : > { %v2290_v44 = vadd.f32 %v2258_v59, %v2226_v9  ;;  %v3217_v54 = vpop.eup %3216  ;;  %v2327_v52 = vadd.f32 %v3868_v12, %v2289_v36  ;;  %v1598_v6 = vmul.f32 %v3523_v51, %v3717_v15  ;;  %v1633_v11 = vmul.f32 %v3542_v3, %v3731_v35 }
 0x1ba   : > { %v1634_v17 = vmul.f32 %v3542_v3, %v5210_v29  ;;  %v2454_v5 = vadd.f32 1.0, %v3217_v54  ;;  %vm4422_vm5 = vcmp.eq.s32.totalorder %v462_v14, 0  ;;  %v1701_v7 = vmul.f32 %v3558_v13, %v5215_v39 }
 0x1bb   : > { %v2328_v46 = vadd.f32 %v3868_v12, %v2290_v44  ;;  %v2391_v0 = vmul.f32 0.70710677, %v2327_v52  ;;  %v1665_v59 = vadd.f32 %v1633_v11, %v1597_v47  ;;  %v1702_v42 = vmul.f32 %v3558_v13, %v5216_v19 }
 0x1bc   : > { %v1666_v57 = vadd.f32 %v1634_v17, %v1598_v6  ;;  %v2485_v38 = vmul.f32 %v2453_v34, %v2357_v1  ;;  %v2486_v25 = vmul.f32 %v2454_v5, %v2358_v28  ;;  %v1770_v22 = vmul.f32 %v3526_v53, %v3717_v15  ;;  %v4445_v15 = vld [vmem:[%s5106_s3 + $0x8] ss:$0 sm:$0xff] }
 0x1bd   : > { %v2392_v8 = vmul.f32 0.70710677, %v2328_v46  ;;  %3218 = verf.f32 %v2391_v0  ;;  %v1733_v12 = vadd.f32 %v1701_v7, %v1665_v59  ;;  %v1771_v63 = vmul.f32 %v3526_v53, %v3731_v35 }
 0x1be   : > { %v1734_v14 = vadd.f32 %v1702_v42, %v1666_v57  ;;  %v2509_v37 = vpack.c.bf16 %v2486_v25, %v2485_v38  ;;  %v1806_v30 = vmul.f32 %v3563_v16, %v5210_v29  ;;  %v1807_v4 = vmul.f32 %v3563_v16, %v5215_v39 }
 0x1bf   : > { %3220 = verf.f32 %v2392_v8  ;;  %vm4438_vm6 = vcmp.eq.s32.totalorder %v469_v21, 15  ;;  %v1875_v28 = vmul.f32 %v4445_v15, %v3815_v32  ;;  %v1937_v61 = vrot.slane %v1561_v50, 7 }
 0x1c0   : > { %v1938_v40 = vrot.slane %v4412_v2, 7  ;;  %3026 = vmatprep.mubr.bf16.mxu1 %v2509_v37  ;;  %v1838_v9 = vadd.f32 %v1806_v30, %v1770_v22  ;;  %v1839_v36 = vadd.f32 %v1807_v4, %v1771_v63  ;;  %v1874_v21 = vmul.f32 %v4445_v15, %v5216_v19 }
 0x1c1   : > { %v308_v47 = vadd.s32 176, %v3481_v27  ;;  %v1961_v44 = vsel %vm1949_vm2, %v1936_v60, %v1937_v61  ;;  %v1427_v50 = vmul.f32 %v3517_v48, %v3731_v35  ;;  %v1428_v54 = vmul.f32 %v3517_v48, %v5210_v29 }
 0x1c2   : > { %v1960_v34 = vsel %vm1949_vm2, %v1937_v61, %v1938_v40  ;;  %v1906_v6 = vadd.f32 %v1874_v21, %v1838_v9  ;;  %v4465_v11 = vadd.f32 %v1875_v28, %v1839_v36  ;;  %v2066_v17 = vsel %vm4422_vm5, 0.0, %v1961_v44 }
 0x1c3   : > { %v2260_v5 = vadd.f32 %v1960_v34, %v1734_v14  ;;  %v2359_v7 = vmul.f32 0.5, %v2327_v52  ;;  %v2360_v0 = vmul.f32 0.5, %v2328_v46  ;;  %v2259_v59 = vadd.f32 %v2066_v17, %v1733_v12 }
 0x1c4   : > { %v1463_v33 = vmul.f32 %v3529_v55, %v5215_v39  ;;  %v2099_v60 = vrot.slane %v1906_v6, 1  ;;  %v2100_v57 = vrot.slane %v4465_v11, 1  ;;  %v1464_v42 = vmul.f32 %v3529_v55, %v5216_v19 }
 0x1c5   : > { %v1531_v38 = vmul.f32 %v3532_v58, %v3815_v32  ;;  %v309_v25 = vadd.s32 184, %v3481_v27  ;;  %v476_v31 = vand.u32 15, %v308_v47  ;;  %v1532_v52 = vmul.f32 %v3532_v58, %v3823_v56 }
 0x1c6   : > { %v1495_v8 = vadd.f32 %v1463_v33, %v1427_v50  ;;  %v2120_v46 = vsel %vm2110_vm4, %v2099_v60, %v2100_v57  ;;  %v2121_v22 = vsel %vm2110_vm4, %v2098_v49, %v2099_v60  ;;  %v1496_v12 = vadd.f32 %v1464_v42, %v1428_v54 }
 0x1c7   : > { %v1599_v14 = vmul.f32 %v3523_v51, %v3731_v35  ;;  %v3219_v63 = vpop.eup %3218  ;;  %v2228_v37 = vsel %vm4438_vm6, 0.0, %v2120_v46  ;;  %v2291_v30 = vadd.f32 %v2259_v59, %v2121_v22  ;;  %v1600_v28 = vmul.f32 %v3523_v51, %v5210_v29  ;;  %v4500_v35 = vld [vmem:[%s5107_s4] ss:$0 sm:$0xff] }
 0x1c8   : > { %v1563_v4 = vadd.f32 %v1531_v38, %v1495_v8  ;;  %v2455_v9 = vadd.f32 1.0, %v3219_v63  ;;  %v2292_v36 = vadd.f32 %v2260_v5, %v2228_v37  ;;  %v4493_v10 = vadd.f32 %v1532_v52, %v1496_v12 }
 0x1c9   : > { %v3221_v61 = vpop.eup %3220  ;;  %v1635_v49 = vmul.f32 %v3542_v3, %v5215_v39  ;;  %v2329_v1 = vadd.f32 %v4500_v35, %v2291_v30  ;;  %v1636_v47 = vmul.f32 %v3542_v3, %v5216_v19  ;;  %v1703_v34 = vmul.f32 %v3558_v13, %v3815_v32 }
 0x1ca   : > { %v2456_v21 = vadd.f32 1.0, %v3221_v61  ;;  %v2487_v44 = vmul.f32 %v2455_v9, %v2359_v7  ;;  %v2330_v50 = vadd.f32 %v4500_v35, %v2292_v36  ;;  %v1704_v6 = vmul.f32 %v3558_v13, %v3823_v56 }
 0x1cb   : > { %v1667_v54 = vadd.f32 %v1635_v49, %v1599_v14  ;;  %v2393_v5 = vmul.f32 0.70710677, %v2329_v1  ;;  %v483_v59 = vand.u32 15, %v309_v25  ;;  %v1668_v33 = vadd.f32 %v1636_v47, %v1600_v28 }
 0x1cc   : > { %v2488_v17 = vmul.f32 %v2456_v21, %v2360_v0  ;;  %v5221_v60 = vrot.slane %v3804_v45, 1  ;;  %v5222_v42 = vrot.slane %v3825_v23, 1  ;;  %v2394_v8 = vmul.f32 0.70710677, %v2330_v50 }
 0x1cd   : > { %v1735_v7 = vadd.f32 %v1703_v34, %v1667_v54  ;;  %v1772_v52 = vmul.f32 %v3526_v53, %v5210_v29  ;;  %3222 = verf.f32 %v2393_v5  ;;  %v1736_v22 = vadd.f32 %v1704_v6, %v1668_v33 }
 0x1ce   : > { %v4516_v38 = vsel %vm2110_vm4, %v5222_v42, %v5221_v60  ;;  %v2510_v46 = vpack.c.bf16 %v2488_v17, %v2487_v44  ;;  %v1773_v0 = vmul.f32 %v3526_v53, %v5215_v39  ;;  %3224 = verf.f32 %v2394_v8 }
 0x1cf   : > { %v1808_v45 = vmul.f32 %v3563_v16, %v5216_v19  ;;  %v1809_v25 = vmul.f32 %v3563_v16, %v3815_v32  ;;  %v1876_v12 = vmul.f32 %v4445_v15, %v3823_v56  ;;  %vm4528_vm7 = vcmp.eq.s32.totalorder %v476_v31, 0 }
 0x1d0   : > { %3027 = vmatmul.mubr.bf16.gmra.mrb[12].mxu1 %v2510_v46  ;;  %vm4532_vm8 = vcmp.eq.s32.totalorder %v483_v59, 15  ;;  %v1939_v63 = vrot.slane %v1563_v4, 7  ;;  %v1940_v37 = vrot.slane %v4493_v10, 7  ;;  %v2361_v30 = vmul.f32 0.5, %v2329_v1  ;;  %v5227_v59 = vld [vmem:[#allocation6_spill] sm:$0xff] }
 0x1d1   : > { %v1840_v28 = vadd.f32 %v1808_v45, %v1772_v52  ;;  %v1841_v61 = vadd.f32 %v1809_v25, %v1773_v0  ;;  %v1877_v9 = vmul.f32 %v4445_v15, %v3811_v41  ;;  %v2362_v36 = vmul.f32 0.5, %v2330_v50 }
 0x1d2   : > { %v1958_v31 = vsel %vm1949_vm2, %v1939_v63, %v1940_v37  ;;  %v1959_v49 = vsel %vm1949_vm2, %v1938_v40, %v1939_v63  ;;  %v310_v4 = vadd.s32 192, %v3481_v27  ;;  %v311_v50 = vadd.s32 200, %v3481_v27 }
 0x1d3   : > { %v1908_v21 = vadd.f32 %v1876_v12, %v1840_v28  ;;  %v4548_v1 = vadd.f32 %v1877_v9, %v1841_v61  ;;  %v2068_v47 = vsel %vm4528_vm7, 0.0, %v1959_v49  ;;  %v2262_v34 = vadd.f32 %v1958_v31, %v1736_v22 }
 0x1d4   : > { %v2261_v44 = vadd.f32 %v2068_v47, %v1735_v7  ;;  %v1429_v54 = vmul.f32 %v3517_v48, %v5215_v39  ;;  %v1465_v2 = vmul.f32 %v3529_v55, %v3815_v32  ;;  %v1430_v17 = vmul.f32 %v3517_v48, %v5216_v19 }
 0x1d5   : > { %v2101_v6 = vrot.slane %v1908_v21, 1  ;;  %v2102_v40 = vrot.slane %v4548_v1, 1  ;;  %v1466_v5 = vmul.f32 %v3529_v55, %v3823_v56  ;;  %v5228_v33 = vand.u32 15, %v5227_v59 }
 0x1d6   : > { %v1497_v42 = vadd.f32 %v1465_v2, %v1429_v54  ;;  %v1533_v8 = vmul.f32 %v3532_v58, %v3811_v41  ;;  %v1534_v7 = vmul.f32 %v3532_v58, %v3813_v26  ;;  %v1601_v52 = vmul.f32 %v3523_v51, %v5215_v39 }
 0x1d7   : > { %vm4564_vm9 = vcmp.eq.s32.totalorder %v5228_v33, 15  ;;  %v2118_v46 = vsel %vm2110_vm4, %v2101_v6, %v2102_v40  ;;  %v2119_v22 = vsel %vm2110_vm4, %v2100_v57, %v2101_v6  ;;  %v1498_v0 = vadd.f32 %v1466_v5, %v1430_v17  ;;  %v3223_v25 = vpop.eup %3222 }
 0x1d8   : > { %v1602_v45 = vmul.f32 %v3523_v51, %v5216_v19  ;;  %v2230_v12 = vsel %vm4532_vm8, 0.0, %v2118_v46  ;;  %v2293_v14 = vadd.f32 %v2261_v44, %v2119_v22  ;;  %v1565_v39 = vadd.f32 %v1533_v8, %v1497_v42  ;;  %v3225_v28 = vpop.eup %3224 }
 0x1d9   : > { %v1637_v63 = vmul.f32 %v3542_v3, %v3815_v32  ;;  %v2457_v61 = vadd.f32 1.0, %v3223_v25  ;;  %v2294_v9 = vadd.f32 %v2262_v34, %v2230_v12  ;;  %v4588_v11 = vadd.f32 %v1534_v7, %v1498_v0 }
 0x1da   : > { %v1638_v57 = vmul.f32 %v3542_v3, %v3823_v56  ;;  %v2458_v31 = vadd.f32 1.0, %v3225_v28  ;;  %v2331_v49 = vadd.f32 %v4500_v35, %v2293_v14  ;;  %v1705_v29 = vmul.f32 %v3558_v13, %v3811_v41 }
 0x1db   : > { %v1669_v21 = vadd.f32 %v1637_v63, %v1601_v52  ;;  %v2332_v47 = vadd.f32 %v4500_v35, %v2294_v9  ;;  %v490_v44 = vand.u32 15, %v310_v4  ;;  %v1706_v2 = vmul.f32 %v3558_v13, %v3813_v26 }
 0x1dc   : > { %v1670_v54 = vadd.f32 %v1638_v57, %v1602_v45  ;;  %v2489_v34 = vmul.f32 %v2457_v61, %v2361_v30  ;;  %v2490_v6 = vmul.f32 %v2458_v31, %v2362_v36  ;;  %v2395_v17 = vmul.f32 0.70710677, %v2331_v49 }
 0x1dd   : > { %v1737_v5 = vadd.f32 %v1705_v29, %v1669_v21  ;;  %v2396_v59 = vmul.f32 0.70710677, %v2332_v47  ;;  %v497_v33 = vand.u32 15, %v311_v50  ;;  %v1774_v8 = vmul.f32 %v3526_v53, %v5216_v19 }
 0x1de   : > { %v1738_v42 = vadd.f32 %v1706_v2, %v1670_v54  ;;  %v2511_v7 = vpack.c.bf16 %v2490_v6, %v2489_v34  ;;  %3226 = verf.f32 %v2395_v17  ;;  %v1775_v52 = vmul.f32 %v3526_v53, %v3815_v32 }
 0x1df   : > { %v1810_v4 = vmul.f32 %v3563_v16, %v3823_v56  ;;  %3228 = verf.f32 %v2396_v59  ;;  %vm4604_vm10 = vcmp.eq.s32.totalorder %v490_v44, 0  ;;  %v1811_v36 = vmul.f32 %v3563_v16, %v3811_v41 }
 0x1e0   : > { %v1879_v50 = vmul.f32 %v4445_v15, %v4065_v20  ;;  %3030 = vmatprep.mubr.bf16.mxu1 %v2511_v7  ;;  %v1878_v46 = vmul.f32 %v4445_v15, %v3813_v26  ;;  %v1941_v22 = vrot.slane %v1565_v39, 7  ;;  %v1942_v0 = vrot.slane %v4588_v11, 7 }
 0x1e1   : > { %v1842_v19 = vadd.f32 %v1810_v4, %v1774_v8  ;;  %v2210_v45 = vsel %vm4564_vm9, 0.0, %v4516_v38  ;;  %v2363_v25 = vmul.f32 0.5, %v2331_v49  ;;  %vm4618_vm11 = vcmp.eq.s32.totalorder %v497_v33, 15 }
 0x1e2   : > { %v1843_v14 = vadd.f32 %v1811_v36, %v1775_v52  ;;  %v1956_v28 = vsel %vm1949_vm2, %v1941_v22, %v1942_v0  ;;  %v1957_v39 = vsel %vm1949_vm2, %v1940_v37, %v1941_v22  ;;  %v1431_v61 = vmul.f32 %v3517_v48, %v3815_v32 }
 0x1e3   : > { %v1910_v63 = vadd.f32 %v1878_v46, %v1842_v19  ;;  %v2070_v57 = vsel %vm4604_vm10, 0.0, %v1957_v39  ;;  %v2264_v31 = vadd.f32 %v1956_v28, %v1738_v42  ;;  %v1432_v49 = vmul.f32 %v3517_v48, %v3823_v56 }
 0x1e4   : > { %v4632_v9 = vadd.f32 %v1879_v50, %v1843_v14  ;;  %v2364_v21 = vmul.f32 0.5, %v2332_v47  ;;  %v2263_v44 = vadd.f32 %v2070_v57, %v1737_v5  ;;  %v1467_v10 = vmul.f32 %v3529_v55, %v3811_v41 }
 0x1e5   : > { %v2103_v29 = vrot.slane %v1910_v63, 1  ;;  %v312_v54 = vadd.s32 208, %v3481_v27  ;;  %v1468_v2 = vmul.f32 %v3529_v55, %v3813_v26  ;;  %v1535_v34 = vmul.f32 %v3532_v58, %v4065_v20 }
 0x1e6   : > { %v2104_v37 = vrot.slane %v4632_v9, 1  ;;  %v1499_v6 = vadd.f32 %v1467_v10, %v1431_v61  ;;  %v1536_v17 = vmul.f32 %v3532_v58, %v4149_v43  ;;  %v1603_v5 = vmul.f32 %v3523_v51, %v3815_v32 }
 0x1e7   : > { %v2117_v47 = vsel %vm2110_vm4, %v2102_v40, %v2103_v29  ;;  %v1500_v42 = vadd.f32 %v1468_v2, %v1432_v49  ;;  %v1604_v1 = vmul.f32 %v3523_v51, %v3823_v56  ;;  %v313_v7 = vadd.s32 216, %v3481_v27 }
 0x1e8   : > { %v2116_v59 = vsel %vm2110_vm4, %v2103_v29, %v2104_v37  ;;  %v2295_v33 = vadd.f32 %v2263_v44, %v2117_v47  ;;  %v3227_v8 = vpop.eup %3226  ;;  %v1639_v52 = vmul.f32 %v3542_v3, %v3811_v41  ;;  %v1640_v32 = vmul.f32 %v3542_v3, %v3813_v26 }
 0x1e9   : > { %v2232_v40 = vsel %vm4618_vm11, 0.0, %v2116_v59  ;;  %v3229_v4 = vpop.eup %3228  ;;  %v2459_v30 = vadd.f32 1.0, %v3227_v8  ;;  %v4668_v19 = vadd.f32 %v1536_v17, %v1500_v42  ;;  %v504_v22 = vand.u32 15, %v312_v54 }
 0x1ea   : > { %v2296_v36 = vadd.f32 %v2264_v31, %v2232_v40  ;;  %v2333_v50 = vadd.f32 %v4500_v35, %v2295_v33  ;;  %v2460_v46 = vadd.f32 1.0, %v3229_v4  ;;  %v1671_v14 = vadd.f32 %v1639_v52, %v1603_v5 }
 0x1eb   : > { %v1672_v12 = vadd.f32 %v1640_v32, %v1604_v1  ;;  %v2491_v63 = vmul.f32 %v2459_v30, %v2363_v25  ;;  %v1567_v61 = vadd.f32 %v1535_v34, %v1499_v6  ;;  %v511_v49 = vand.u32 15, %v313_v7 }
 0x1ec   : > { %v2334_v28 = vadd.f32 %v4500_v35, %v2296_v36  ;;  %v2397_v39 = vmul.f32 0.70710677, %v2333_v50  ;;  %v2492_v57 = vmul.f32 %v2460_v46, %v2364_v21  ;;  %v1708_v29 = vmul.f32 %v3558_v13, %v4149_v43 }
 0x1ed   : > { %v1776_v31 = vmul.f32 %v3526_v53, %v3823_v56  ;;  %v1707_v10 = vmul.f32 %v3558_v13, %v4065_v20  ;;  %v1777_v25 = vmul.f32 %v3526_v53, %v3811_v41  ;;  %v1812_v21 = vmul.f32 %v3563_v16, %v3813_v26 }
 0x1ee   : > { %v2398_v44 = vmul.f32 0.70710677, %v2334_v28  ;;  %3230 = verf.f32 %v2397_v39  ;;  %v2512_v54 = vpack.c.bf16 %v2492_v57, %v2491_v63  ;;  %v1740_v2 = vadd.f32 %v1708_v29, %v1672_v12  ;;  %v5239_v39 = vld [vmem:[#allocation12_spill] sm:$0xff]  ;;  %v5240_v57 = vld [vmem:[#allocation15_spill] sm:$0xff] }
 0x1ef   : > { %v1813_v34 = vmul.f32 %v3563_v16, %v4065_v20  ;;  %vm4683_vm12 = vcmp.eq.s32.totalorder %v504_v22, 0  ;;  %v1880_v56 = vmul.f32 %v4445_v15, %v4149_v43  ;;  %v1943_v6 = vrot.slane %v1567_v61, 7 }
 0x1f0   : > { %3232 = verf.f32 %v2398_v44  ;;  %3031 = vmatmul.mubr.bf16.gmra.mrb[16].mxu1 %v2512_v54  ;;  %v1844_v17 = vadd.f32 %v1812_v21, %v1776_v31  ;;  %v1881_v59 = vmul.f32 %v4445_v15, %v3837_v18  ;;  %v1944_v33 = vrot.slane %v4668_v19, 7 }
 0x1f1   : > { %v1845_v5 = vadd.f32 %v1813_v34, %v1777_v25  ;;  %vm4692_vm13 = vcmp.eq.s32.totalorder %v511_v49, 15  ;;  %v1739_v1 = vadd.f32 %v1707_v10, %v1671_v14  ;;  %v1955_v8 = vsel %vm1949_vm2, %v1942_v0, %v1943_v6 }
 0x1f2   : > { %v1912_v40 = vadd.f32 %v1880_v56, %v1844_v17  ;;  %v1954_v52 = vsel %vm1949_vm2, %v1943_v6, %v1944_v33  ;;  %v2072_v32 = vsel %vm4683_vm12, 0.0, %v1955_v8  ;;  %v2365_v4 = vmul.f32 0.5, %v2333_v50 }
 0x1f3   : > { %v4700_v7 = vadd.f32 %v1881_v59, %v1845_v5  ;;  %v2265_v30 = vadd.f32 %v2072_v32, %v1739_v1  ;;  %v2266_v36 = vadd.f32 %v1954_v52, %v1740_v2  ;;  %v1436_v11 = vmul.f32 %v3517_v48, %v4149_v43  ;;  %v5241_v1 = vld [vmem:[#allocation13_spill] sm:$0xff]  ;;  %v5242_v52 = vld [vmem:[#allocation14_spill] sm:$0xff] }
 0x1f4   : > { %v2105_v46 = vrot.slane %v1912_v40, 1  ;;  %v3320_v22 = vmov 0   ;;  %v287_v63 = vadd.s32 8, %v3481_v27  ;;  %v1441_v61 = vmul.f32 %v3529_v55, %v5239_v39 }
 0x1f5   : > { %v2106_v0 = vrot.slane %v4700_v7, 1  ;;  %v4711_v14 = vunpack.c.l.bf16 %v3320_v22  ;;  %v4713_v12 = vunpack.c.h.bf16 %v3320_v22  ;;  %v1442_v50 = vmul.f32 %v3529_v55, %v5240_v57 }
 0x1f6   : > { %v1472_v49 = vmul.f32 %v3529_v55, %v3853_v24  ;;  %v2115_v31 = vsel %vm2110_vm4, %v2104_v37, %v2105_v46  ;;  %v322_v21 = vand.u32 15, %v3481_v27  ;;  %v2366_v37 = vmul.f32 0.5, %v2334_v28 }
 0x1f7   : > { %v2114_v29 = vsel %vm2110_vm4, %v2105_v46, %v2106_v0  ;;  %v1405_v44 = vmul.f32 %v3517_v48, %v4711_v14  ;;  %v1406_v10 = vmul.f32 %v3517_v48, %v4713_v12  ;;  %v2297_v2 = vadd.f32 %v2265_v30, %v2115_v31 }
 0x1f8   : > { %v3231_v25 = vpop.eup %3230  ;;  %v2234_v54 = vsel %vm4692_vm13, 0.0, %v2114_v29  ;;  %v1504_v34 = vadd.f32 %v1472_v49, %v1436_v11  ;;  %v329_v59 = vand.u32 15, %v287_v63  ;;  %v1509_v8 = vmul.f32 %v3532_v58, %v5241_v1 }
 0x1f9   : > { %v2461_v47 = vadd.f32 1.0, %v3231_v25  ;;  %v2298_v56 = vadd.f32 %v2266_v36, %v2234_v54  ;;  %v1473_v9 = vadd.f32 %v1441_v61, %v1405_v44  ;;  %v1474_v6 = vadd.f32 %v1442_v50, %v1406_v10 }
 0x1fa   : > { %v3233_v17 = vpop.eup %3232  ;;  %v2335_v5 = vadd.f32 %v4500_v35, %v2297_v2  ;;  %v1510_v32 = vmul.f32 %v3532_v58, %v5242_v52  ;;  %v1540_v30 = vmul.f32 %v3532_v58, %v4713_v12  ;;  %vm4745_vm14 = vcmp.eq.s32.totalorder %v322_v21, 0 }
 0x1fb   : > { %v2462_v40 = vadd.f32 1.0, %v3233_v17  ;;  %v2336_v42 = vadd.f32 %v4500_v35, %v2298_v56  ;;  %v2493_v36 = vmul.f32 %v2461_v47, %v2365_v4  ;;  %v1541_v28 = vadd.f32 %v1509_v8, %v1473_v9 }
 0x1fc   : > { %v2399_v11 = vmul.f32 0.70710677, %v2335_v5  ;;  %v1577_v22 = vmul.f32 %v3523_v51, %v4711_v14  ;;  %v2367_v61 = vmul.f32 0.5, %v2335_v5  ;;  %v4751_v49 = vadd.f32 %v1510_v32, %v1474_v6 }
 0x1fd   : > { %v2494_v63 = vmul.f32 %v2462_v40, %v2366_v37  ;;  %v2400_v50 = vmul.f32 0.70710677, %v2336_v42  ;;  %v1578_v29 = vmul.f32 %v3523_v51, %v4713_v12  ;;  %v1613_v4 = vmul.f32 %v3542_v3, %v5239_v39 }
 0x1fe   : > { %3234 = verf.f32 %v2399_v11  ;;  %v1614_v31 = vmul.f32 %v3542_v3, %v5240_v57  ;;  %vm4759_vm15 = vcmp.eq.s32.totalorder %v329_v59, 15  ;;  %v4763_v25 = vadd.f32 %v1540_v30, %v1504_v34 }
 0x1ff   : > { %v2513_v44 = vpack.c.bf16 %v2494_v63, %v2493_v36  ;;  %3236 = verf.f32 %v2400_v50  ;;  %v1749_v54 = vmul.f32 %v3526_v53, %v4711_v14  ;;  %v1681_v2 = vmul.f32 %v3558_v13, %v5241_v1 }
 0x200   : > { %v1682_v21 = vmul.f32 %v3558_v13, %v5242_v52  ;;  %v1750_v47 = vmul.f32 %v3526_v53, %v4713_v12  ;;  %v1751_v56 = vmul.f32 %v3526_v53, %v5239_v39  ;;  %v1645_v9 = vadd.f32 %v1613_v4, %v1577_v22 }
 0x201   : > { %3034 = vmatprep.mubr.bf16.mxu1 %v2513_v44  ;;  %v1785_v34 = vmul.f32 %v3563_v16, %v5239_v39  ;;  %v1786_v6 = vmul.f32 %v3563_v16, %v5240_v57  ;;  %v1787_v17 = vmul.f32 %v3563_v16, %v5241_v1  ;;  %v1646_v37 = vadd.f32 %v1614_v31, %v1578_v29 }
 0x202   : > { %v1853_v5 = vmul.f32 %v4445_v15, %v5241_v1  ;;  %v1854_v59 = vmul.f32 %v4445_v15, %v5242_v52  ;;  %v1855_v8 = vmul.f32 %v4445_v15, %v3642_v62  ;;  %v1917_v39 = vrot.slane %v1541_v28, 7 }
 0x203   : > { %v1817_v40 = vadd.f32 %v1785_v34, %v1749_v54  ;;  %v1818_v32 = vadd.f32 %v1786_v6, %v1750_v47  ;;  %v1819_v30 = vadd.f32 %v1787_v17, %v1751_v56  ;;  %v1918_v36 = vrot.slane %v4751_v49, 7 }
 0x204   : > { %v1948_v57 = vrot.slane %v4763_v25, 7  ;;  %v314_v11 = vadd.s32 224, %v3481_v27  ;;  %v315_v22 = vadd.s32 232, %v3481_v27  ;;  %v2368_v63 = vmul.f32 0.5, %v2336_v42 }
 0x205   : > { %v4791_v50 = vadd.f32 %v1853_v5, %v1817_v40  ;;  %v1886_v29 = vadd.f32 %v1854_v59, %v1818_v32  ;;  %v4793_v4 = vadd.f32 %v1855_v8, %v1819_v30  ;;  %v1713_v31 = vadd.f32 %v1681_v2, %v1645_v9 }
 0x206   : > { %v1714_v44 = vadd.f32 %v1682_v21, %v1646_v37  ;;  %v1980_v28 = vsel %vm1949_vm2, %v1917_v39, %v1918_v36  ;;  %v1981_v54 = vsel %vm1949_vm2, %v1948_v57, %v1917_v39  ;;  %v518_v9 = vand.u32 15, %v314_v11 }
 0x207   : > { %v2046_v42 = vsel %vm4745_vm14, 0.0, %v1981_v54  ;;  %v2078_v47 = vrot.slane %v4791_v50, 1  ;;  %v2079_v56 = vrot.slane %v1886_v29, 1  ;;  %v2080_v34 = vrot.slane %v4793_v4, 1 }
 0x208   : > { %v3235_v2 = vpop.eup %3234  ;;  %v2239_v21 = vadd.f32 %v2046_v42, %v1713_v31  ;;  %v525_v6 = vand.u32 15, %v315_v22  ;;  %v1433_v17 = vmul.f32 %v3517_v48, %v3811_v41  ;;  %v2240_v8 = vadd.f32 %v1980_v28, %v1714_v44 }
 0x209   : > { %v3237_v37 = vpop.eup %3236  ;;  %v2463_v5 = vadd.f32 1.0, %v3235_v2  ;;  %v2140_v46 = vsel %vm2110_vm4, %v2079_v56, %v2080_v34  ;;  %v2141_v59 = vsel %vm2110_vm4, %v2078_v47, %v2079_v56  ;;  %v1469_v39 = vmul.f32 %v3529_v55, %v4065_v20  ;;  %v5254_v56 = vld [vmem:[#allocation25_spill] sm:$0xff] }
 0x20a   : > { %v2464_v40 = vadd.f32 1.0, %v3237_v37  ;;  %v2208_v32 = vsel %vm4759_vm15, 0.0, %v2140_v46  ;;  %v2271_v30 = vadd.f32 %v2239_v21, %v2141_v59  ;;  %v1434_v29 = vmul.f32 %v3517_v48, %v3813_v26 }
 0x20b   : > { %v2495_v11 = vmul.f32 %v2463_v5, %v2367_v61  ;;  %v2272_v22 = vadd.f32 %v2240_v8, %v2208_v32  ;;  %v1470_v31 = vmul.f32 %v3529_v55, %v4149_v43  ;;  %v1501_v44 = vadd.f32 %v1469_v39, %v1433_v17 }
 0x20c   : > { %v2496_v54 = vmul.f32 %v2464_v40, %v2368_v63  ;;  %v2309_v42 = vadd.f32 %v4500_v35, %v2271_v30  ;;  %v1537_v10 = vmul.f32 %v3532_v58, %v3837_v18  ;;  %vm4829_vm0 = vcmp.eq.s32.totalorder %v518_v9, 0 }
 0x20d   : > { %v2310_v28 = vadd.f32 %v4500_v35, %v2272_v22  ;;  %v1502_v61 = vadd.f32 %v1470_v31, %v1434_v29  ;;  %v1538_v2 = vmul.f32 %v3532_v58, %v3853_v24  ;;  %v1605_v63 = vmul.f32 %v3523_v51, %v3811_v41 }
 0x20e   : > { %v2514_v21 = vpack.c.bf16 %v2496_v54, %v2495_v11  ;;  %v2373_v37 = vmul.f32 0.70710677, %v2309_v42  ;;  %v1569_v5 = vadd.f32 %v1537_v10, %v1501_v44  ;;  %v1606_v59 = vmul.f32 %v3523_v51, %v3813_v26 }
 0x20f   : > { %v2374_v17 = vmul.f32 0.70710677, %v2310_v28  ;;  %v4837_v46 = vadd.f32 %v1538_v2, %v1502_v61  ;;  %v1641_v9 = vmul.f32 %v3542_v3, %v4065_v20  ;;  %vm4843_vm1 = vcmp.eq.s32.totalorder %v525_v6, 15 }
 0x210   : > { %3035 = vmatmul.mubr.bf16.gmra.mrb[20].mxu1 %v2514_v21  ;;  %3238 = verf.f32 %v2373_v37  ;;  %v1642_v40 = vmul.f32 %v3542_v3, %v4149_v43  ;;  %v1709_v41 = vmul.f32 %v3558_v13, %v3837_v18  ;;  %v1710_v32 = vmul.f32 %v3558_v13, %v3853_v24 }
 0x211   : > { %3240 = verf.f32 %v2374_v17  ;;  %v1673_v30 = vadd.f32 %v1641_v9, %v1605_v63  ;;  %v1778_v39 = vmul.f32 %v3526_v53, %v3813_v26  ;;  %v1779_v6 = vmul.f32 %v3526_v53, %v4065_v20 }
 0x212   : > { %v1674_v11 = vadd.f32 %v1642_v40, %v1606_v59  ;;  %v1814_v22 = vmul.f32 %v3563_v16, %v4149_v43  ;;  %v1815_v29 = vmul.f32 %v3563_v16, %v3837_v18  ;;  %v1882_v31 = vmul.f32 %v4445_v15, %v3853_v24 }
 0x213   : > { %v1741_v54 = vadd.f32 %v1709_v41, %v1673_v30  ;;  %v1883_v44 = vmul.f32 %v4445_v15, %v4711_v14  ;;  %v1945_v10 = vrot.slane %v1569_v5, 7  ;;  %v1946_v26 = vrot.slane %v4837_v46, 7 }
 0x214   : > { %v1742_v61 = vadd.f32 %v1710_v32, %v1674_v11  ;;  %v1846_v2 = vadd.f32 %v1814_v22, %v1778_v39  ;;  %v1847_v21 = vadd.f32 %v1815_v29, %v1779_v6  ;;  %v288_v37 = vadd.s32 16, %v3481_v27  ;;  %v5251_v6 = vld [vmem:[#allocation16_spill] sm:$0xff]  ;;  %v5252_v11 = vld [vmem:[#allocation17_spill] sm:$0xff] }
 0x215   : > { %v1952_v63 = vsel %vm1949_vm2, %v1945_v10, %v1946_v26  ;;  %v1953_v17 = vsel %vm1949_vm2, %v1944_v33, %v1945_v10  ;;  %v1615_v5 = vmul.f32 %v3542_v3, %v5241_v1  ;;  %v1616_v59 = vmul.f32 %v3542_v3, %v5242_v52  ;;  %v5253_v52 = vld [vmem:[#allocation18_spill] sm:$0xff] }
 0x216   : > { %v1914_v9 = vadd.f32 %v1882_v31, %v1846_v2  ;;  %v4879_v40 = vadd.f32 %v1883_v44, %v1847_v21  ;;  %v2074_v41 = vsel %vm4829_vm0, 0.0, %v1953_v17  ;;  %v2268_v32 = vadd.f32 %v1952_v63, %v1742_v61 }
 0x217   : > { %v2267_v30 = vadd.f32 %v2074_v41, %v1741_v54  ;;  %v336_v39 = vand.u32 15, %v288_v37  ;;  %v1647_v19 = vadd.f32 %v1615_v5, %v5251_v6  ;;  %v1648_v22 = vadd.f32 %v1616_v59, %v5252_v11  ;;  %v5256_v41 = vld [vmem:[#allocation26_spill] sm:$0xff] }
 0x218   : > { %v2107_v33 = vrot.slane %v1914_v9, 1  ;;  %v2108_v29 = vrot.slane %v4879_v40, 1  ;;  %v1683_v1 = vmul.f32 %v3558_v13, %v3642_v62  ;;  %v1684_v31 = vmul.f32 %v3558_v13, %v5253_v52 }
 0x219   : > { %v2341_v44 = vmul.f32 0.5, %v2309_v42  ;;  %v2342_v10 = vmul.f32 0.5, %v2310_v28  ;;  %vm704_vm3 = vcmp.eq.s32.totalorder %v336_v39, 0  ;;  %v5255_v61 = vrot.slane %v5254_v56, 7 }
 0x21a   : > { %v3239_v2 = vpop.eup %3238  ;;  %v2112_v21 = vsel %vm2110_vm4, %v2107_v33, %v2108_v29  ;;  %v2113_v62 = vsel %vm2110_vm4, %v2106_v0, %v2107_v33  ;;  %v1715_v42 = vadd.f32 %v1683_v1, %v1647_v19  ;;  %v1716_v28 = vadd.f32 %v1684_v31, %v1648_v22 }
 0x21b   : > { %v1979_v54 = vsel %vm1949_vm2, %v1918_v36, %v5255_v61  ;;  %v3241_v37 = vpop.eup %3240  ;;  %v2437_v63 = vadd.f32 1.0, %v3239_v2  ;;  %v2236_v49 = vsel %vm4843_vm1, 0.0, %v2112_v21  ;;  %v2299_v17 = vadd.f32 %v2267_v30, %v2113_v62 }
 0x21c   : > { %v2048_v36 = vsel %vm704_vm3, 0.0, %v1979_v54  ;;  %v2438_v5 = vadd.f32 1.0, %v3241_v37  ;;  %v2300_v59 = vadd.f32 %v2268_v32, %v2236_v49  ;;  %v2242_v39 = vadd.f32 %v5256_v41, %v1716_v28 }
 0x21d   : > { %v2241_v9 = vadd.f32 %v2048_v36, %v1715_v42  ;;  %v2469_v6 = vmul.f32 %v2437_v63, %v2341_v44  ;;  %v2337_v7 = vadd.f32 %v4500_v35, %v2299_v17  ;;  %v5257_v11 = vrot.slane %v3825_v23, 1 }
 0x21e   : > { %v2470_v19 = vmul.f32 %v2438_v5, %v2342_v10  ;;  %v2338_v8 = vadd.f32 %v4500_v35, %v2300_v59  ;;  %v2274_v32 = vadd.f32 %v2242_v39, %v2210_v45  ;;  %v316_v33 = vadd.s32 240, %v3481_v27 }
 0x21f   : > { %v2139_v0 = vsel %vm2110_vm4, %v2080_v34, %v5257_v11  ;;  %v2401_v22 = vmul.f32 0.70710677, %v2337_v7  ;;  %v1435_v34 = vmul.f32 %v3517_v48, %v4065_v20  ;;  %v317_v60 = vadd.s32 248, %v3481_v27 }
 0x220   : > { %v2273_v30 = vadd.f32 %v2241_v9, %v2139_v0  ;;  %v2501_v1 = vpack.c.bf16 %v2470_v19, %v2469_v6  ;;  %v2402_v52 = vmul.f32 0.70710677, %v2338_v8  ;;  %v2312_v4 = vadd.f32 %v4500_v35, %v2274_v32 }
 0x221   : > { %3242 = verf.f32 %v2401_v22  ;;  %v1471_v38 = vmul.f32 %v3529_v55, %v3837_v18  ;;  %v532_v44 = vand.u32 15, %v316_v33  ;;  %v1539_v10 = vmul.f32 %v3532_v58, %v4711_v14 }
 0x222   : > { %v2311_v23 = vadd.f32 %v4500_v35, %v2273_v30  ;;  %3010 = vmatprep.mubr.bf16.mxu0 %v2501_v1  ;;  %3244 = verf.f32 %v2402_v52  ;;  %v2376_v45 = vmul.f32 0.70710677, %v2312_v4  ;;  %v1607_v56 = vmul.f32 %v3523_v51, %v4065_v20 }
 0x223   : > { %v1503_v61 = vadd.f32 %v1471_v38, %v1435_v34  ;;  %v1608_v48 = vmul.f32 %v3523_v51, %v4149_v43  ;;  %v1643_v54 = vmul.f32 %v3542_v3, %v3837_v18  ;;  %v1644_v55 = vmul.f32 %v3542_v3, %v3853_v24 }
 0x224   : > { %v2375_v31 = vmul.f32 0.70710677, %v2311_v23  ;;  %v1711_v2 = vmul.f32 %v3558_v13, %v4711_v14  ;;  %v1712_v58 = vmul.f32 %v3558_v13, %v4713_v12  ;;  %v1780_v62 = vmul.f32 %v3526_v53, %v4149_v43 }
 0x225   : > { %v1571_v21 = vadd.f32 %v1539_v10, %v1503_v61  ;;  %v1675_v20 = vadd.f32 %v1643_v54, %v1607_v56  ;;  %v1816_v51 = vmul.f32 %v3563_v16, %v3853_v24  ;;  %v1676_v42 = vadd.f32 %v1644_v55, %v1608_v48 }
 0x226   : > { %3246 = verf.f32 %v2375_v31  ;;  %v1884_v18 = vmul.f32 %v4445_v15, %v4713_v12  ;;  %v539_v28 = vand.u32 15, %v317_v60  ;;  %vm4947_vm5 = vcmp.eq.s32.totalorder %v532_v44, 0 }
 0x227   : > { %3248 = verf.f32 %v2376_v45  ;;  %v1848_v14 = vadd.f32 %v1816_v51, %v1780_v62  ;;  %v1947_v37 = vrot.slane %v1571_v21, 7  ;;  %v1744_v13 = vadd.f32 %v1712_v58, %v1676_v42 }
 0x228   : > { %v1743_v63 = vadd.f32 %v1711_v2, %v1675_v20  ;;  %v2369_v43 = vmul.f32 0.5, %v2337_v7  ;;  %vm4961_vm6 = vcmp.eq.s32.totalorder %v539_v28, 15  ;;  %v2343_v39 = vmul.f32 0.5, %v2311_v23 }
 0x229   : > { %v1916_v49 = vadd.f32 %v1884_v18, %v1848_v14  ;;  %v1950_v53 = vsel %vm1949_vm2, %v1947_v37, %v1948_v57  ;;  %v1951_v16 = vsel %vm1949_vm2, %v1946_v26, %v1947_v37  ;;  %v2370_v57 = vmul.f32 0.5, %v2338_v8 }
 0x22a   : > { %v2076_v15 = vsel %vm4947_vm5, 0.0, %v1951_v16  ;;  %v2270_v12 = vadd.f32 %v1950_v53, %v1744_v13  ;;  %v2344_v30 = vmul.f32 0.5, %v2312_v4 }
 0x22b   : > { %v3243_v24 = vpop.eup %3242  ;;  %v2109_v25 = vrot.slane %v1916_v49, 1  ;;  %v2269_v59 = vadd.f32 %v2076_v15, %v1743_v63 }
 0x22c   : > { %v3245_v17 = vpop.eup %3244  ;;  %v2465_v36 = vadd.f32 1.0, %v3243_v24 }
 0x22d   : > { %v2466_v9 = vadd.f32 1.0, %v3245_v17  ;;  %v2111_v26 = vsel %vm2110_vm4, %v2108_v29, %v2109_v25  ;;  %v2142_v6 = vsel %vm2110_vm4, %v2109_v25, %v2078_v47 }
 0x22e   : > { %v2497_v41 = vmul.f32 %v2465_v36, %v2369_v43  ;;  %v2238_v19 = vsel %vm4961_vm6, 0.0, %v2142_v6  ;;  %v2301_v8 = vadd.f32 %v2269_v59, %v2111_v26 }
 0x22f   : > { %v2498_v11 = vmul.f32 %v2466_v9, %v2370_v57  ;;  %v2302_v22 = vadd.f32 %v2270_v12, %v2238_v19 }
 0x230   : > { %v3247_v46 = vpop.eup %3246  ;;  %v2339_v1 = vadd.f32 %v4500_v35, %v2301_v8 }
 0x231   : > { %v3249_v7 = vpop.eup %3248  ;;  %v2439_v0 = vadd.f32 1.0, %v3247_v46  ;;  %v2515_v33 = vpack.c.bf16 %v2498_v11, %v2497_v41  ;;  %v2340_v50 = vadd.f32 %v4500_v35, %v2302_v22  ;;  %v4983_v35 = vld [vmem:[%s5109_s6] ss:$0 sm:$0xff] }
 0x232   : > { %v2440_v32 = vadd.f32 1.0, %v3249_v7  ;;  %v2403_v27 = vmul.f32 0.70710677, %v2339_v1  ;;  %v2371_v34 = vmul.f32 0.5, %v2339_v1 }
 0x233   : > { %v2471_v40 = vmul.f32 %v2439_v0, %v2343_v39  ;;  %3038 = vmatprep.mubr.bf16.mxu1 %v2515_v33  ;;  %v2404_v52 = vmul.f32 0.70710677, %v2340_v50  ;;  %v2372_v60 = vmul.f32 0.5, %v2340_v50 }
 0x234   : > { %v2472_v29 = vmul.f32 %v2440_v32, %v2344_v30  ;;  %3250 = verf.f32 %v2403_v27 }
 0x235   : > { %3252 = verf.f32 %v2404_v52 }
 0x236   : > { %v2502_v47 = vpack.c.bf16 %v2472_v29, %v2471_v40 }
 0x238   : > { %3011 = vmatmul.mubr.bf16.vlgmr.msra.gmra.mrb[32].mxu0 %v2502_v47 }
 0x23e   : > { %v3251_v23 = vpop.eup %3250 }
 0x23f   : > { %v3253_v4 = vpop.eup %3252  ;;  %v2467_v31 = vadd.f32 1.0, %v3251_v23 }
 0x240   : > { %v2468_v38 = vadd.f32 1.0, %v3253_v4 }
 0x241   : > { %v2499_v45 = vmul.f32 %v2467_v31, %v2371_v34 }
 0x242   : > { %v2500_v44 = vmul.f32 %v2468_v38, %v2372_v60 }
 0x244   : > { %v2516_v10 = vpack.c.bf16 %v2500_v44, %v2499_v45 }
 0x246   : > { %3039 = vmatmul.mubr.bf16.gmra.mrb[24].mxu1 %v2516_v10 }
 0x247   : > { %v3016_v56 = vpop.f32.mrb[0].mxu1 }
 0x248   : > { %v2646_v61 = vadd.f32 %v3016_v56, %v4983_v35  ;;  %v2637_v48 = vpop.f32.mrb[1].mxu1 }
 0x249   : > { %v2638_v54 = vadd.f32 %v4983_v35, %v2637_v48  ;;  %v3017_v55 = vpop.f32.mrb[2].mxu1 }
 0x24a   : > { %2754 = vst [vmem:[%s4987_s9 + $0x30] sm:$0xff] %v2646_v61  ;;  %v2649_v2 = vadd.f32 %v3017_v55, %v4983_v35  ;;  %v2640_v58 = vpop.f32.mrb[3].mxu1 }
 0x24b   : > { %2752 = vst [vmem:[%s4987_s9 + $0x20] sm:$0xff] %v2638_v54  ;;  %v2641_v21 = vadd.f32 %v4983_v35, %v2640_v58 }
 0x24c   : > { %2755 = vst [vmem:[%s4987_s9 + $0x38] sm:$0xff] %v2649_v2 }
 0x24d   : > { %2753 = vst [vmem:[%s4987_s9 + $0x28] sm:$0xff] %v2641_v21 }
 0x264   : > { %v3020_v20 = vpop.f32.mrb[4].mxu1 }
 0x265   : > { %v2662_v62 = vadd.f32 %v3020_v20, %v4983_v35  ;;  %v2653_v51 = vpop.f32.mrb[5].mxu1 }
 0x266   : > { %v2654_v42 = vadd.f32 %v4983_v35, %v2653_v51  ;;  %v3021_v18 = vpop.f32.mrb[6].mxu1 }
 0x267   : > { %2758 = vst [vmem:[%s4987_s9 + $0x50] sm:$0xff] %v2662_v62  ;;  %v2665_v28 = vadd.f32 %v3021_v18, %v4983_v35  ;;  %v2656_v3 = vpop.f32.mrb[7].mxu1 }
 0x268   : > { %2756 = vst [vmem:[%s4987_s9 + $0x40] sm:$0xff] %v2654_v42  ;;  %v2657_v14 = vadd.f32 %v4983_v35, %v2656_v3 }
 0x269   : > { %2759 = vst [vmem:[%s4987_s9 + $0x58] sm:$0xff] %v2665_v28 }
 0x26a   : > { %2757 = vst [vmem:[%s4987_s9 + $0x48] sm:$0xff] %v2657_v14 }
 0x283   : > { %v3024_v37 = vpop.f32.mrb[8].mxu1 }
 0x284   : > { %v2678_v13 = vadd.f32 %v3024_v37, %v4983_v35  ;;  %v2669_v63 = vpop.f32.mrb[9].mxu1 }
 0x285   : > { %v2670_v49 = vadd.f32 %v4983_v35, %v2669_v63  ;;  %v3025_v53 = vpop.f32.mrb[10].mxu1 }
 0x286   : > { %2762 = vst [vmem:[%s4987_s9 + $0x70] sm:$0xff] %v2678_v13  ;;  %v2681_v16 = vadd.f32 %v3025_v53, %v4983_v35  ;;  %v2672_v24 = vpop.f32.mrb[11].mxu1 }
 0x287   : > { %2760 = vst [vmem:[%s4987_s9 + $0x60] sm:$0xff] %v2670_v49  ;;  %v2673_v43 = vadd.f32 %v4983_v35, %v2672_v24 }
 0x288   : > { %2763 = vst [vmem:[%s4987_s9 + $0x78] sm:$0xff] %v2681_v16 }
 0x289   : > { %2761 = vst [vmem:[%s4987_s9 + $0x68] sm:$0xff] %v2673_v43 }
 0x2a3   : > { %v3028_v15 = vpop.f32.mrb[12].mxu1 }
 0x2a4   : > { %v2694_v12 = vadd.f32 %v3028_v15, %v4983_v35  ;;  %v2685_v17 = vpop.f32.mrb[13].mxu1 }
 0x2a5   : > { %v2686_v36 = vadd.f32 %v4983_v35, %v2685_v17  ;;  %v3029_v5 = vpop.f32.mrb[14].mxu1 }
 0x2a6   : > { %2766 = vst [vmem:[%s4987_s9 + $0x90] sm:$0xff] %v2694_v12  ;;  %v2697_v25 = vadd.f32 %v3029_v5, %v4983_v35  ;;  %v2688_v59 = vpop.f32.mrb[15].mxu1 }
 0x2a7   : > { %2764 = vst [vmem:[%s4987_s9 + $0x80] sm:$0xff] %v2686_v36  ;;  %v2689_v57 = vadd.f32 %v4983_v35, %v2688_v59 }
 0x2a8   : > { %2767 = vst [vmem:[%s4987_s9 + $0x98] sm:$0xff] %v2697_v25 }
 0x2a9   : > { %2765 = vst [vmem:[%s4987_s9 + $0x88] sm:$0xff] %v2689_v57 }
 0x2c3   : > { %v3032_v9 = vpop.f32.mrb[16].mxu1 }
 0x2c4   : > { %v2710_v46 = vadd.f32 %v3032_v9, %v4983_v35  ;;  %v2701_v41 = vpop.f32.mrb[17].mxu1 }
 0x2c5   : > { %v2702_v39 = vadd.f32 %v4983_v35, %v2701_v41  ;;  %v3033_v26 = vpop.f32.mrb[18].mxu1 }
 0x2c6   : > { %2770 = vst [vmem:[%s4987_s9 + $0xb0] sm:$0xff] %v2710_v46  ;;  %v2713_v6 = vadd.f32 %v3033_v26, %v4983_v35  ;;  %v2704_v7 = vpop.f32.mrb[19].mxu1 }
 0x2c7   : > { %2768 = vst [vmem:[%s4987_s9 + $0xa0] sm:$0xff] %v2702_v39  ;;  %v2705_v11 = vadd.f32 %v4983_v35, %v2704_v7 }
 0x2c8   : > { %2771 = vst [vmem:[%s4987_s9 + $0xb8] sm:$0xff] %v2713_v6 }
 0x2c9   : > { %2769 = vst [vmem:[%s4987_s9 + $0xa8] sm:$0xff] %v2705_v11 }
 0x2e3   : > { %v3036_v0 = vpop.f32.mrb[20].mxu1 }
 0x2e4   : > { %v2726_v19 = vadd.f32 %v3036_v0, %v4983_v35  ;;  %v2717_v8 = vpop.f32.mrb[21].mxu1 }
 0x2e5   : > { %v2718_v30 = vadd.f32 %v4983_v35, %v2717_v8  ;;  %v3037_v32 = vpop.f32.mrb[22].mxu1 }
 0x2e6   : > { %2774 = vst [vmem:[%s4987_s9 + $0xd0] sm:$0xff] %v2726_v19  ;;  %v2729_v22 = vadd.f32 %v3037_v32, %v4983_v35  ;;  %v2720_v33 = vpop.f32.mrb[23].mxu1 }
 0x2e7   : > { %2772 = vst [vmem:[%s4987_s9 + $0xc0] sm:$0xff] %v2718_v30  ;;  %v2721_v40 = vadd.f32 %v4983_v35, %v2720_v33 }
 0x2e8   : > { %2775 = vst [vmem:[%s4987_s9 + $0xd8] sm:$0xff] %v2729_v22 }
 0x2e9   : > { %2773 = vst [vmem:[%s4987_s9 + $0xc8] sm:$0xff] %v2721_v40 }
 0x30b   : > { %v3012_v1 = vpop.f32.mrb[32].mxu0 }
 0x30c   : > { %v2630_v29 = vadd.f32 %v3012_v1, %v4983_v35  ;;  %v2621_v50 = vpop.f32.mrb[33].mxu0 }
 0x30d   : > { %v2622_v27 = vadd.f32 %v4983_v35, %v2621_v50  ;;  %v3013_v47 = vpop.f32.mrb[34].mxu0 }
 0x30e   : > { %2750 = vst [vmem:[%s4987_s9 + $0x10] sm:$0xff] %v2630_v29  ;;  %v2633_v52 = vadd.f32 %v3013_v47, %v4983_v35  ;;  %v2624_v23 = vpop.f32.mrb[35].mxu0 }
 0x30f   : > { %2748 = vst [vmem:[%s4987_s9] sm:$0xff] %v2622_v27  ;;  %v2625_v4 = vadd.f32 %v4983_v35, %v2624_v23 }
 0x310   : > { %2751 = vst [vmem:[%s4987_s9 + $0x18] sm:$0xff] %v2633_v52 }
 0x311   : > { %2749 = vst [vmem:[%s4987_s9 + $0x8] sm:$0xff] %v2625_v4 }
 0x319   : > { %v3040_v34 = vpop.f32.mrb[24].mxu1 }
 0x31a   : > { %v2742_v31 = vadd.f32 %v3040_v34, %v4983_v35  ;;  %v2733_v60 = vpop.f32.mrb[25].mxu1 }
 0x31b   : > { %v2734_v38 = vadd.f32 %v4983_v35, %v2733_v60  ;;  %v3041_v45 = vpop.f32.mrb[26].mxu1 }
 0x31c   : > { %2778 = vst [vmem:[%s4987_s9 + $0xf0] sm:$0xff] %v2742_v31  ;;  %v2745_v44 = vadd.f32 %v3041_v45, %v4983_v35  ;;  %v2736_v10 = vpop.f32.mrb[27].mxu1 }
 0x31d   : > { %2776 = vst [vmem:[%s4987_s9 + $0xe0] sm:$0xff] %v2734_v38  ;;  %v2737_v56 = vadd.f32 %v4983_v35, %v2736_v10 }
 0x31e   : > { %2779 = vst [vmem:[%s4987_s9 + $0xf8] sm:$0xff] %v2745_v44 }
 0x31f   : > { %2777 = vst [vmem:[%s4987_s9 + $0xe8] sm:$0xff] %v2737_v56 }
 0x320   : > { %3269 = shalt.err (!%p3266_p3)
}
 0x321   : > { %s3270_s22 = scalar_lea.hbm %s5052_s17, 4096  ;;  %s3274_s8 = scalar_lea.hbm %s5110_s7, 8192 }
 0x322   : > { %p3271_p4 = scmp.ne.s32.totalorder %s5052_s17, %s3270_s22  ;;  %p3275_p9 = scmp.lt.u32.totalorder %s5052_s17, %s5110_s7 }
 0x323   : > { %p3276_p10 = scmp.lt.u32.totalorder %s3274_s8, %s3270_s22  ;;  %p3278_p12 = scmp.lt.u32.totalorder %s3270_s22, %s5052_s17 }
 0x324   : > { %p3272_p7 = pnand %p3271_p4, %p3402_p5 }
 0x325   : > { %p3277_p11 = por %p3276_p10, %p3275_p9 }
 0x326   : > { %p3273_p8 = pneg %p3272_p7 }
 0x327   : > { %p3279_p13 = por %p3278_p12, %p3277_p11 }
 0x329   : > { %p3280_p0 = pnand %p3279_p13, %p3273_p8 }
 0x32b   : > { %3283 = shalt.err (!%p3280_p0)
}
 0x32c   : > { %s3322_s15 = smov 128   ;;  %s3323_s16 = smov 8  }
 0x32d   : > { %3058 = dma.vmem_to_hbm [thread:$0]  (%p3402_p5), %s5054_s14, 4096, %s5052_s17, %s5062_s28, %s3322_s15, %s3322_s15, %s3323_s16  }
 0x32e PF: > { %p3064_p1 = scmp.ge.s32.totalorder %s3318_s27, 2  ;;  %s2809_s18 = sand.u32 1, %s3306_s24  }
 0x32f   : > { %s2810_s19 = scalar_lea.sflag [#allocation4], %s2809_s18 }
 0x330   : > { %p3061_p2 = pnand %p3064_p1, %p3406_p6 }
 0x332   : > { %3301 = dma.done.wait (!%p3061_p2), %s2810_s19, 4096  }
 0x333   : > { %3303 = vsyncadd (!%p3061_p2), %s2810_s19, 4294963200  ;;  %p17_p3 = scmp.ge.s32.totalorder %s3389_s30, 4   ;;  %s5262_s24 = smov %s3310_s25 }
 0x334   : > { %s5263_s25 = smov %s3314_s26  ;;  %s5264_s26 = smov %s3400_s10 }
 0x335   : > { %s5265_s27 = smov %s3389_s30  ;;  %19 = sbr.rel (!%p17_p3) target bundleno = 3 (0x3), region = 83 }
 0x33c   :  { %2815 = vsyncpa [#allocation4], 1 }
 0x33d   :  { %2817 = vsyncpa [#allocation4 + $0x1], 1 }

</bundles_post_ra>
